<compile_context>
chip_gen: v7x
topology: tpu7x:2x2x1
jax: 0.10.0
libtpu: 0.0.40
codegen_flags: <defaults>
</compile_context>

<pallas_src>
import functools

import jax
import jax.numpy as jnp
from jax.experimental import pallas as pl
from jax.experimental.pallas import tpu as pltpu


def generate_grid(H, W):
    # Mirrors torch.meshgrid(x, y) (default 'ij' indexing) -> shape (W, H, 2)
    x = jnp.linspace(0.0, 1.0, W, dtype=jnp.float32)
    y = jnp.linspace(0.0, 1.0, H, dtype=jnp.float32)
    X, Y = jnp.meshgrid(x, y, indexing="ij")
    return jnp.stack([X, Y], axis=-1)


# ---------------------------------------------------------------------------
# Small-N path: batch on sublanes, grid on lanes, single un-gridded call.
# ---------------------------------------------------------------------------
def _grid_rbf_small_kernel(px_ref, py_ref, gx_ref, gy_ref, wt_ref, out_ref, *, stable):
    # px/py: (Np, 1) pre-scaled points ((p - eps) / temp), batch on sublanes.
    # gx/gy: (1, G8) pre-scaled grid   (g / temp),         grid cells on lanes.
    # wt   : (G8, 8) col 0 = valid mask (denominator), col 1 = depth (numerator).
    dx = gx_ref[...] - px_ref[...]                    # (Np, G8)
    dy = gy_ref[...] - py_ref[...]
    logits = -jnp.sqrt(dx * dx + dy * dy)             # == -pairwise_distance / temp
    if stable:                                        # only needed for very small temp
        logits = logits - jnp.max(logits, axis=-1, keepdims=True)
    e = jnp.exp(logits)                               # (Np, G8) unnormalized probs
    red = jnp.dot(e, wt_ref[...], preferred_element_type=jnp.float32,
                  precision=jax.lax.Precision.HIGHEST)  # (Np, 8)
    out_ref[...] = red[:, 1:2] / red[:, 0:1]


def _grid_rbf_small(points_image, flat_grid, depth_flat, eps, inv_temp, stable):
    N = points_image.shape[0]
    G = flat_grid.shape[0]
    Np = max(8, -(-N // 8) * 8)
    G8 = -(-G // 8) * 8

    px = jnp.zeros((Np, 1), jnp.float32).at[:N, 0].set((points_image[:, 0] - eps) * inv_temp)
    py = jnp.zeros((Np, 1), jnp.float32).at[:N, 0].set((points_image[:, 1] - eps) * inv_temp)
    gx = jnp.zeros((1, G8), jnp.float32).at[0, :G].set(flat_grid[:, 0] * inv_temp)
    gy = jnp.zeros((1, G8), jnp.float32).at[0, :G].set(flat_grid[:, 1] * inv_temp)
    wt = jnp.zeros((G8, 8), jnp.float32).at[:G, 0].set(1.0).at[:G, 1].set(depth_flat)

    out = pl.pallas_call(
        functools.partial(_grid_rbf_small_kernel, stable=stable),
        out_shape=jax.ShapeDtypeStruct((Np, 1), jnp.float32),
    )(px, py, gx, gy, wt)
    return out[:N, :]


# ---------------------------------------------------------------------------
# Large-N path: batch on lanes, grid on sublanes, G-tiled with a VMEM accumulator.
# ---------------------------------------------------------------------------
def _grid_rbf_large_kernel(pxy_ref, gx_ref, gy_ref, w_ref, out_ref, acc_ref, *, stable):
    # pxy: (2, TILE_N)  row 0 = x, row 1 = y of pre-scaled points, batch on lanes.
    # gx/gy: (G_TILE, 1) pre-scaled grid slab for this g-step, grid on sublanes.
    # w  : (8, G_TILE)  row 0 = valid mask, row 1 = depth, rows 2..7 = 0.
    # acc: (8, TILE_N)  running [denominator; numerator; ...] accumulator.
    g = pl.program_id(1)

    @pl.when(g == 0)
    def _init():
        acc_ref[...] = jnp.zeros_like(acc_ref)

    px = pxy_ref[0:1, :]                              # (1, TILE_N)
    py = pxy_ref[1:2, :]
    dx = gx_ref[...] - px                             # (G_TILE, TILE_N)
    dy = gy_ref[...] - py
    logits = -jnp.sqrt(dx * dx + dy * dy)
    if stable:                                        # only used with a single G tile
        logits = logits - jnp.max(logits, axis=0, keepdims=True)
    e = jnp.exp(logits)

    # Both grid-axis reductions in one MXU matmul:
    #   acc[0] += sum_g e[g, n]   ;   acc[1] += sum_g depth[g] * e[g, n]
    acc_ref[...] += jnp.dot(w_ref[...], e, preferred_element_type=jnp.float32,
                            precision=jax.lax.Precision.HIGHEST)

    @pl.when(g == pl.num_programs(1) - 1)
    def _finish():
        red = acc_ref[...]
        out_ref[...] = red[1:2, :] / red[0:1, :]      # deferred, exact softmax divide


def _grid_rbf_large(points_image, flat_grid, depth_flat, eps, inv_temp, stable):
    N = points_image.shape[0]
    G = flat_grid.shape[0]

    # Smoothed batch tiling: keeps >= 2 N-tiles for mid-size batches (v7x megacore)
    # while amortizing the ~0.35 us/grid-step overhead for big batches.
    TILE_N = 128 if N <= 256 else (256 if N <= 1024 else 512)
    n_tiles = -(-N // TILE_N)
    Np = n_tiles * TILE_N

    # Grid tiling: a single tile padded only to a multiple of 8 when it fits the
    # ~2 MiB-per-temporary budget, otherwise 128-aligned tiles with the accumulator.
    G8 = -(-G // 8) * 8
    g_budget = max(512, (((2 * 1024 * 1024) // (4 * TILE_N)) // 128) * 128)
    if G8 <= g_budget or stable:
        # TODO(synk): with a tiny temp AND a huge grid this single-tile fallback can
        # pressure VMEM; a flash-style online max over G tiles would remove it.
        G_TILE, g_tiles = G8, 1
    else:
        G_TILE = g_budget
        g_tiles = -(-G // G_TILE)
    Gp = g_tiles * G_TILE

    # Fold eps and 1/temp into the inputs (O(N + G) wrapper work instead of O(N*G)
    # per-element adds/divides in the kernel). px/py packed -> one DMA per step.
    pxy = jnp.zeros((2, Np), jnp.float32)
    pxy = pxy.at[0, :N].set((points_image[:, 0] - eps) * inv_temp)
    pxy = pxy.at[1, :N].set((points_image[:, 1] - eps) * inv_temp)
    gx = jnp.zeros((Gp, 1), jnp.float32).at[:G, 0].set(flat_grid[:, 0] * inv_temp)
    gy = jnp.zeros((Gp, 1), jnp.float32).at[:G, 0].set(flat_grid[:, 1] * inv_temp)

    # MXU reduction weights; zero columns for g >= G mask padded grid cells exactly.
    w = jnp.zeros((8, Gp), jnp.float32)
    w = w.at[0, :G].set(1.0)
    w = w.at[1, :G].set(depth_flat)

    out = pl.pallas_call(
        functools.partial(_grid_rbf_large_kernel, stable=stable),
        out_shape=jax.ShapeDtypeStruct((1, Np), jnp.float32),
        grid=(n_tiles, g_tiles),
        in_specs=[
            pl.BlockSpec((2, TILE_N), lambda i, g: (0, i)),   # packed points
            pl.BlockSpec((G_TILE, 1), lambda i, g: (g, 0)),   # gx
            pl.BlockSpec((G_TILE, 1), lambda i, g: (g, 0)),   # gy
            pl.BlockSpec((8, G_TILE), lambda i, g: (0, g)),   # reduction weights
        ],
        out_specs=pl.BlockSpec((1, TILE_N), lambda i, g: (0, i)),
        scratch_shapes=[pltpu.VMEM((8, TILE_N), jnp.float32)],
        compiler_params=pltpu.CompilerParams(
            dimension_semantics=("parallel", "arbitrary")),
    )(pxy, gx, gy, w)

    return out[0, :N].reshape(N, 1)


def grid_rbf_forward(points_image, depth_map, grid, temp=1.0):
    """points_image: (N, 2) f32; depth_map: (H, W) f32; grid: (W, H, 2) f32 -> (N, 1)."""
    points_image = points_image.astype(jnp.float32)
    flat_grid = grid.reshape(-1, 2).astype(jnp.float32)   # same flatten order as torch
    depth_flat = depth_map.reshape(-1).astype(jnp.float32)

    eps = 1e-6                      # F.pairwise_distance eps (added to the difference)
    inv_temp = 1.0 / float(temp)
    # logits are bounded in [-sqrt(2)/temp, 0] so exp cannot overflow; the max
    # subtraction only matters for very small temps (denominator underflow).
    stable = float(temp) < 0.1

    N = points_image.shape[0]
    if N <= 64:
        return _grid_rbf_small(points_image, flat_grid, depth_flat, eps, inv_temp, stable)
    return _grid_rbf_large(points_image, flat_grid, depth_flat, eps, inv_temp, stable)

    # TODO(synk): the predict_from_state=True MLP branch (state != None) is unused in
    # the default config / forward call with state=None, so it is not implemented.


def _ref_forward(points_image, depth_map, grid, temp=1.0):
    # Pure-JAX reference of the PyTorch forward (for correctness check).
    flat_grid = grid.reshape(-1, 2)
    diff = flat_grid[None, :, :] - points_image[:, None, :] + 1e-6
    dist = jnp.sqrt(jnp.sum(diff * diff, axis=-1))
    probs = jax.nn.softmax(-dist / temp, axis=-1)
    return jnp.sum(probs * depth_map.reshape(-1)[None, :], axis=-1, keepdims=True)


def _check(key, N, grid_size, temp, prior=1.0):
    grid = generate_grid(*grid_size)                        # (W, H, 2)
    k_pts, k_depth = jax.random.split(key)
    points_image = jax.random.uniform(k_pts, (N, 2), dtype=jnp.float32)
    # depth_map is a learnable parameter (init = prior); perturb it so the check
    # exercises the depth-weighted sum, not just softmax normalization.
    depth_map = prior + 0.1 * jax.random.normal(k_depth, grid_size, dtype=jnp.float32)

    out = jax.block_until_ready(grid_rbf_forward(points_image, depth_map, grid, temp=temp))
    ref = _ref_forward(points_image, depth_map, grid, temp=temp)
    assert out.shape == (N, 1)
    assert jnp.allclose(out, ref, atol=1e-4, rtol=1e-4), (out, ref)


if __name__ == "__main__":
    key = jax.random.PRNGKey(0)
    k1, k2 = jax.random.split(key)

    # Module defaults: grid_size=(20, 20), temp=1, prior=1 — exercises the small-N
    # (batch-on-sublanes) path.
    _check(k1, N=16, grid_size=(20, 20), temp=1.0)

    # Larger batch + larger grid — exercises the lane-major path with 2 N-tiles and
    # the G-tiled VMEM accumulator (G=6400 -> 2 G-tiles of 4096 at TILE_N=128).
    _check(k2, N=200, grid_size=(80, 80), temp=0.5)

    print("KERNEL_OK")
</pallas_src>

<mosaic_0001>
module attributes {stable_mosaic.version = 11 : i64} {
  func.func @_grid_rbf_small_kernel(%arg0: memref<16x1xf32, #tpu.memory_space<vmem>>, %arg1: memref<16x1xf32, #tpu.memory_space<vmem>>, %arg2: memref<1x400xf32, #tpu.memory_space<vmem>>, %arg3: memref<1x400xf32, #tpu.memory_space<vmem>>, %arg4: memref<400x8xf32, #tpu.memory_space<vmem>>, %arg5: memref<16x1xf32, #tpu.memory_space<vmem>>) attributes {dimension_semantics = [], scalar_prefetch = 0 : i64, scratch_operands = 0 : i64, tpu.core_type = #tpu.core_type<tc>} {
    %c0 = arith.constant 0 : index
    %c0_0 = arith.constant 0 : index
    %0 = vector.load %arg2[%c0, %c0_0] : memref<1x400xf32, #tpu.memory_space<vmem>>, vector<1x400xf32>
    %c0_1 = arith.constant 0 : index
    %c0_2 = arith.constant 0 : index
    %1 = vector.load %arg0[%c0_1, %c0_2] : memref<16x1xf32, #tpu.memory_space<vmem>>, vector<16x1xf32>
    %2 = vector.broadcast %0 : vector<1x400xf32> to vector<16x400xf32>
    %3 = vector.broadcast %1 : vector<16x1xf32> to vector<16x400xf32>
    %4 = arith.subf %2, %3 : vector<16x400xf32>
    %c0_3 = arith.constant 0 : index
    %c0_4 = arith.constant 0 : index
    %5 = vector.load %arg3[%c0_3, %c0_4] : memref<1x400xf32, #tpu.memory_space<vmem>>, vector<1x400xf32>
    %c0_5 = arith.constant 0 : index
    %c0_6 = arith.constant 0 : index
    %6 = vector.load %arg1[%c0_5, %c0_6] : memref<16x1xf32, #tpu.memory_space<vmem>>, vector<16x1xf32>
    %7 = vector.broadcast %5 : vector<1x400xf32> to vector<16x400xf32>
    %8 = vector.broadcast %6 : vector<16x1xf32> to vector<16x400xf32>
    %9 = arith.subf %7, %8 : vector<16x400xf32>
    %10 = arith.mulf %4, %4 : vector<16x400xf32>
    %11 = arith.mulf %9, %9 : vector<16x400xf32>
    %12 = arith.addf %10, %11 : vector<16x400xf32>
    %13 = math.sqrt %12 : vector<16x400xf32>
    %cst = arith.constant 0.000000e+00 : f32
    %14 = vector.broadcast %cst : f32 to vector<16x400xf32>
    %15 = arith.subf %14, %13 : vector<16x400xf32>
    %16 = math.exp %15 : vector<16x400xf32>
    %c0_7 = arith.constant 0 : index
    %c0_8 = arith.constant 0 : index
    %17 = vector.load %arg4[%c0_7, %c0_8] : memref<400x8xf32, #tpu.memory_space<vmem>>, vector<400x8xf32>
    %cst_9 = arith.constant dense<0.000000e+00> : vector<16x8xf32>
    %18 = tpu.matmul %16, %17, %cst_9 {dimension_numbers = #tpu.dot_dimension_numbers<[1], [0], [0], [1], [0, 0, 1, 1], [], []>, precision = #tpu.contract_precision<fp32>} : vector<16x400xf32>, vector<400x8xf32>, vector<16x8xf32> -> vector<16x8xf32>
    %19 = vector.extract_strided_slice %18 {offsets = [0, 1], sizes = [16, 1], strides = [1, 1]} : vector<16x8xf32> to vector<16x1xf32>
    %20 = vector.extract_strided_slice %18 {offsets = [0, 0], sizes = [16, 1], strides = [1, 1]} : vector<16x8xf32> to vector<16x1xf32>
    %21 = arith.divf %19, %20 : vector<16x1xf32>
    %c0_10 = arith.constant 0 : index
    %c0_11 = arith.constant 0 : index
    %22 = vector.load %arg5[%c0_10, %c0_11] : memref<16x1xf32, #tpu.memory_space<vmem>>, vector<16x1xf32>
    tpu.vector_store %arg5[%c0_10, %c0_11], %21 {strides = array<i32>} : memref<16x1xf32, #tpu.memory_space<vmem>>, vector<16x1xf32>,
    return
  }
}

</mosaic_0001>

<bundles_post_ra>
// kernel: tpu_custom_call.1
= control target key start
LH: loop header
LB: loop body
LE: loop exit
PB: predicated region body
PF: predicated region fallthrough
CT: control target
= control target key end

     0   :  { %v24_v0 = vlaneseq  ;;  %v2590_v1 = vmov 0   ;;  %vm258_vm10 = vcmask 130048   ;;  %s2593_s14 = smov 127   ;;  %s3940_s0 = inlined_call_operand.vmem [shape: f32[16,1], index: 0, kind: input, shape index: {}]   ;;  %s3941_s1 = inlined_call_operand.vmem [shape: f32[16,1], index: 1, kind: input, shape index: {}]   ;;  %s3942_s2 = inlined_call_operand.vmem [shape: f32[1,400], index: 2, kind: input, shape index: {}]   ;;  %s3943_s4 = inlined_call_operand.vmem [shape: f32[400,8], index: 4, kind: input, shape index: {}]   ;;  %s3944_s3 = inlined_call_operand.vmem [shape: f32[1,400], index: 3, kind: input, shape index: {}]   ;;  %s3945_s5 = inlined_call_operand.vmem [shape: f32[16,1], index: 5, kind: output, shape index: {}]  }
   0x1   :  { %2552 = vset.pattern.permute.xlu0 %v2590_v1  ;;  %v21_v2 = vld [vmem:[%s3940_s0] sm:$0xff]  ;;  %2553 = vset.pattern.permute.xlu1 %v2590_v1  ;;  %v22_v3 = vld [vmem:[%s3940_s0 + $0x8] sm:$0xff]  ;;  %v2684_v20 = vld [vmem:[%s3943_s4 + $0x90] sm:$0xff] }
   0x2   :  { %46 = vperm.xlu0 %2552, %v21_v2   ;;  %51 = vperm.xlu1 %2553, %v22_v3   ;;  %v63_v4 = vld [vmem:[%s3941_s1] sm:$0xff]  ;;  %v64_v5 = vld [vmem:[%s3941_s1 + $0x8] sm:$0xff]  ;;  %v2636_v6 = vshrl.u32 %v24_v0, 7  ;;  %v2689_v21 = vld [vmem:[%s3943_s4 + $0x98] sm:$0xff]  ;;  %v320_v29 = vand.u32 4294901760, %v2684_v20 }
   0x3   :  { %v2641_v7 = vld [vmem:[%s3943_s4 + $0x80] sm:$0xff]  ;;  %v2651_v9 = vld [vmem:[%s3943_s4 + $0x88] sm:$0xff]  ;;  %v2697_v23 = vld [vmem:[%s3943_s4 + $0x10] sm:$0xff]  ;;  %v323_v30 = vand.u32 4294901760, %v2689_v21 }
   0x4   :  { %v2646_v8 = vld [vmem:[%s3942_s2] sm:$0xf]  ;;  %v314_v10 = vand.u32 4294901760, %v2641_v7  ;;  %v34_v12 = vsub.s32 2, %v2636_v6  ;;  %v2668_v14 = vld [vmem:[%s3943_s4 + $0x8] sm:$0xff]  ;;  %v317_v15 = vand.u32 4294901760, %v2651_v9  ;;  %v2733_v37 = vsub.f32 %v2684_v20, %v320_v29 }
   0x5   :  { %v2657_v11 = vld [vmem:[%s3943_s4] sm:$0xff]  ;;  %v269_v18 = vand.u32 4294901760, %v2668_v14  ;;  %v2702_v24 = vld [vmem:[%s3943_s4 + $0x18] sm:$0xff]  ;;  %v272_v31 = vand.u32 4294901760, %v2697_v23  ;;  %v2738_v38 = vsub.f32 %v2689_v21, %v323_v30  ;;  %v2770_v49 = vld [vmem:[%s3943_s4 + $0xa8] sm:$0xff] }
   0x6   :  { %v2663_v13 = vld [vmem:[%s3944_s3] sm:$0xf]  ;;  %v2674_v16 = vsub.f32 %v2641_v7, %v314_v10  ;;  %v266_v17 = vand.u32 4294901760, %v2657_v11  ;;  %88 = vperm.xlu0 %2552, %v63_v4   ;;  %93 = vperm.xlu1 %2553, %v64_v5   ;;  %v2679_v19 = vrot.slane %v2646_v8, %v34_v12  ;;  %v2708_v26 = vsub.f32 %v2651_v9, %v317_v15  ;;  %v2800_v63 = vld [vmem:[%s3943_s4 + $0x28] sm:$0xff]  ;;  %v2805_v0 = vld [vmem:[%s3943_s4 + $0xb0] sm:$0xff] }
   0x7   :  { %v2692_v22 = vrot.slane %v2663_v13, %v34_v12  ;;  %v2718_v28 = vsub.f32 %v2668_v14, %v269_v18  ;;  %v275_v35 = vand.u32 4294901760, %v2702_v24  ;;  %v2743_v39 = vsub.f32 %v2697_v23, %v272_v31  ;;  %v2748_v40 = vld [vmem:[%s3943_s4 + $0xa0] sm:$0xff]  ;;  %v2810_v1 = vld [vmem:[%s3943_s4 + $0xb8] sm:$0xff] }
   0x8   :  { %4006 = vst [vmem:[#allocation2_spill] sm:$0xff] %v2674_v16  ;;  %v3967_v25 = vand.u32 4294901760, %v2674_v16  ;;  %4007 = vst [vmem:[#allocation3_spill] sm:$0xff] %v2708_v26  ;;  %v2713_v27 = vsub.f32 %v2657_v11, %v266_v17  ;;  %v3966_v33 = vand.u32 4294901760, %v2708_v26  ;;  %v3958_v46 = vand.u32 4294901760, %v2733_v37  ;;  %v2786_v58 = vld [vmem:[%s3943_s4 + $0x20] sm:$0xff] }
   0x9   :  { %v3961_v36 = vand.u32 4294901760, %v2718_v28  ;;  %v2759_v44 = vsub.f32 %v2702_v24, %v275_v35  ;;  %v3954_v47 = vand.u32 4294901760, %v2738_v38  ;;  %v3953_v48 = vand.u32 4294901760, %v2743_v39  ;;  %v2858_v7 = vld [vmem:[%s3943_s4 + $0x38] sm:$0xff]  ;;  %v2863_v9 = vld [vmem:[%s3943_s4 + $0xc0] sm:$0xff] }
   0xa   :  { %v508_v32 = vsub.f32 %v2674_v16, %v3967_v25  ;;  %v3962_v34 = vand.u32 4294901760, %v2713_v27  ;;  %v515_v42 = vsub.f32 %v2708_v26, %v3966_v33  ;;  %v326_v53 = vand.u32 4294901760, %v2748_v40  ;;  %v2909_v20 = vld [vmem:[%s3943_s4 + $0x40] sm:$0xff] }
   0xb   :  { %v403_v45 = vsub.f32 %v2718_v28, %v3961_v36  ;;  %v3949_v52 = vand.u32 4294901760, %v2759_v44  ;;  %v522_v55 = vsub.f32 %v2733_v37, %v3958_v46  ;;  %v529_v56 = vsub.f32 %v2738_v38, %v3954_v47 }
   0xc   :  { %v509_v41 = vand.u32 4294901760, %v508_v32  ;;  %v396_v43 = vsub.f32 %v2713_v27, %v3962_v34  ;;  %v516_v50 = vand.u32 4294901760, %v515_v42  ;;  %v410_v57 = vsub.f32 %v2743_v39, %v3953_v48 }
   0xd   :  { %v404_v54 = vand.u32 4294901760, %v403_v45  ;;  %v417_v60 = vsub.f32 %v2759_v44, %v3949_v52  ;;  %v329_v61 = vand.u32 4294901760, %v2770_v49  ;;  %v2795_v62 = vsub.f32 %v2748_v40, %v326_v53  ;;  %v2904_v52 = vld [vmem:[%s3943_s4 + $0xc8] sm:$0xff] }
   0xe   :  { %v397_v51 = vand.u32 4294901760, %v396_v43  ;;  %v2206_v59 = vpack.c.bf16 %v516_v50, %v509_v41  ;;  %v523_v3 = vand.u32 4294901760, %v522_v55  ;;  %v530_v4 = vand.u32 4294901760, %v529_v56 }
   0xf   :  { %v411_v5 = vand.u32 4294901760, %v410_v57  ;;  %v418_v12 = vand.u32 4294901760, %v417_v60  ;;  %v3946_v32 = vand.u32 4294901760, %v2795_v62  ;;  %v2816_v41 = vsub.f32 %v2770_v49, %v329_v61  ;;  %v2964_v49 = vld [vmem:[%s3943_s4 + $0xd8] sm:$0xff] }
  0x10   :  { %v2208_v2 = vpack.c.bf16 %v404_v54, %v397_v51  ;;  %2207 = vmatprep.subr.bf16.mxu1 %v2206_v59  ;;  %v278_v42 = vand.u32 4294901760, %v2786_v58  ;;  %v2210_v43 = vpack.c.bf16 %v530_v4, %v523_v3  ;;  %v281_v45 = vand.u32 4294901760, %v2800_v63  ;;  %v2834_v59 = vld [vmem:[%s3943_s4 + $0x30] sm:$0xff] }
  0x11   :  { %v332_v50 = vand.u32 4294901760, %v2805_v0  ;;  %v335_v51 = vand.u32 4294901760, %v2810_v1  ;;  %v2212_v54 = vpack.c.bf16 %v418_v12, %v411_v5  ;;  %v536_v55 = vsub.f32 %v2795_v62, %v3946_v32 }
  0x12   :  { %2209 = vmatpush3.bf16.msra.mxu1 %v2208_v2  ;;  %v3947_v56 = vand.u32 4294901760, %v2816_v41  ;;  %v2829_v57 = vsub.f32 %v2786_v58, %v278_v42  ;;  %v2840_v60 = vpack.c.bf16 %v317_v15, %v314_v10  ;;  %v2843_v2 = vsub.f32 %v2800_v63, %v281_v45 }
  0x13   :  { %2211 = vmatprep.subr.bf16.mxu1 %v2210_v43  ;;  %v2848_v3 = vsub.f32 %v2805_v0, %v332_v50  ;;  %v2853_v4 = vsub.f32 %v2810_v1, %v335_v51  ;;  %v537_v10 = vand.u32 4294901760, %v536_v55  ;;  %v2872_v63 = vpack.c.bf16 %v269_v18, %v266_v17 }
  0x14   :  { %4008 = vst [vmem:[#allocation4_spill] sm:$0xff] %v2840_v60  ;;  %v543_v15 = vsub.f32 %v2816_v41, %v3947_v56  ;;  %v3948_v5 = vand.u32 4294901760, %v2829_v57  ;;  %2175 = vmatprep.subr.bf16.mxu0 %v2840_v60  ;;  %v3952_v12 = vand.u32 4294901760, %v2843_v2  ;;  %v284_v32 = vand.u32 4294901760, %v2834_v59 }
  0x15   :  { %v3951_v43 = vand.u32 4294901760, %v2848_v3  ;;  %v3950_v55 = vand.u32 4294901760, %v2853_v4  ;;  %2177 = vmatpush3.bf16.msra.mxu0 %v2872_v63  ;;  %v287_v14 = vand.u32 4294901760, %v2858_v7  ;;  %v338_v17 = vand.u32 4294901760, %v2863_v9 }
  0x16   :  { %2213 = vmatpush3.bf16.msra.mxu1 %v2212_v54  ;;  %v544_v56 = vand.u32 4294901760, %v543_v15  ;;  %v424_v11 = vsub.f32 %v2829_v57, %v3948_v5  ;;  %v431_v18 = vsub.f32 %v2843_v2, %v3952_v12  ;;  %v2893_v54 = vpack.c.bf16 %v323_v30, %v320_v29 }
  0x17   :  { %v550_v15 = vsub.f32 %v2848_v3, %v3951_v43  ;;  %v557_v5 = vsub.f32 %v2853_v4, %v3950_v55  ;;  %v2915_v30 = vpack.c.bf16 %v275_v35, %v272_v31  ;;  %v2918_v55 = vsub.f32 %v2834_v59, %v284_v32  ;;  %v2935_v35 = vld [vmem:[%s3943_s4 + $0x48] sm:$0xff] }
  0x18   :  { %v2214_v21 = vpack.c.bf16 %v544_v56, %v537_v10  ;;  %v425_v29 = vand.u32 4294901760, %v424_v11  ;;  %v432_v43 = vand.u32 4294901760, %v431_v18  ;;  %2179 = vmatprep.subr.bf16.mxu0 %v2893_v54  ;;  %v2922_v47 = vsub.f32 %v2858_v7, %v287_v14  ;;  %v2948_v11 = vld [vmem:[%s3943_s4 + $0xd0] sm:$0xff] }
  0x19   :  { %v551_v12 = vand.u32 4294901760, %v550_v15  ;;  %v558_v48 = vand.u32 4294901760, %v557_v5  ;;  %2181 = vmatpush3.bf16.msra.mxu0 %v2915_v30  ;;  %v3957_v23 = vand.u32 4294901760, %v2918_v55  ;;  %v341_v24 = vand.u32 4294901760, %v2904_v52 }
  0x1a   :  { %2215 = vmatprep.subr.bf16.mxu1 %v2214_v21  ;;  %v2930_v31 = vsub.f32 %v2863_v9, %v338_v17  ;;  %v290_v56 = vand.u32 4294901760, %v2909_v20  ;;  %v2216_v59 = vpack.c.bf16 %v432_v43, %v425_v29  ;;  %v3956_v10 = vand.u32 4294901760, %v2922_v47 }
  0x1b   :  { %v2218_v7 = vpack.c.bf16 %v558_v48, %v551_v12  ;;  %v2943_v5 = vpack.c.bf16 %v329_v61, %v326_v53  ;;  %v438_v18 = vsub.f32 %v2918_v55, %v3957_v23  ;;  %v2955_v48 = vsub.f32 %v2904_v52, %v341_v24 }
  0x1c   :  { %v3955_v43 = vand.u32 4294901760, %v2930_v31  ;;  %v2959_v40 = vpack.c.bf16 %v281_v45, %v278_v42  ;;  %2217 = vmatpush3.bf16.msra.mxu1 %v2216_v59  ;;  %v445_v53 = vsub.f32 %v2922_v47, %v3956_v10  ;;  %v293_v61 = vand.u32 4294901760, %v2935_v35 }
  0x1d   :  { %4009 = vst [vmem:[#allocation5_spill] sm:$0xff] %v2943_v5  ;;  %2183 = vmatprep.subr.bf16.mxu0 %v2943_v5  ;;  %v2974_v52 = vsub.f32 %v2909_v20, %v290_v56  ;;  %v2980_v58 = vpack.c.bf16 %v335_v51, %v332_v50  ;;  %2219 = vmatprep.subr.bf16.mxu1 %v2218_v7  ;;  %v439_v42 = vand.u32 4294901760, %v438_v18  ;;  %v3960_v12 = vand.u32 4294901760, %v2955_v48  ;;  %v2997_v50 = vld [vmem:[%s3943_s4 + $0x50] sm:$0xff]  ;;  %v3002_v51 = vld [vmem:[%s3943_s4 + $0x58] sm:$0xff] }
  0x1e   :  { %4010 = vst [vmem:[#allocation6_spill] sm:$0xff] %v2959_v40  ;;  %v564_v45 = vsub.f32 %v2930_v31, %v3955_v43  ;;  %2185 = vmatpush3.bf16.msra.mxu0 %v2959_v40  ;;  %v344_v15 = vand.u32 4294901760, %v2948_v11  ;;  %v446_v21 = vand.u32 4294901760, %v445_v53  ;;  %v2990_v0 = vsub.f32 %v2935_v35, %v293_v61 }
  0x1f   :  { %4011 = vst [vmem:[#allocation7_spill] sm:$0xff] %v2980_v58  ;;  %v3959_v29 = vand.u32 4294901760, %v2974_v52  ;;  %2187 = vmatprep.subr.bf16.mxu0 %v2980_v58  ;;  %v347_v1 = vand.u32 4294901760, %v2964_v49  ;;  %v571_v35 = vsub.f32 %v2955_v48, %v3960_v12  ;;  %v3010_v18 = vpack.c.bf16 %v287_v14, %v284_v32  ;;  %v3026_v14 = vld [vmem:[%s3943_s4 + $0xe0] sm:$0xff] }
  0x20   :  { %v565_v59 = vand.u32 4294901760, %v564_v45  ;;  %v3008_v7 = vsub.f32 %v2948_v11, %v344_v15  ;;  %v2220_v53 = vpack.c.bf16 %v446_v21, %v439_v42  ;;  %v3963_v10 = vand.u32 4294901760, %v2990_v0  ;;  %v3031_v42 = vld [vmem:[%s3943_s4 + $0xe8] sm:$0xff] }
  0x21   :  { %4012 = vst [vmem:[#allocation8_spill] sm:$0xff] %v3010_v18  ;;  %v452_v43 = vsub.f32 %v2974_v52, %v3959_v29  ;;  %v3017_v23 = vsub.f32 %v2964_v49, %v347_v1  ;;  %v572_v45 = vand.u32 4294901760, %v571_v35  ;;  %v296_v11 = vand.u32 4294901760, %v2997_v50 }
  0x22   :  { %v3965_v46 = vand.u32 4294901760, %v3008_v7  ;;  %2189 = vmatpush3.bf16.msra.mxu0 %v3010_v18  ;;  %v299_v32 = vand.u32 4294901760, %v3002_v51  ;;  %2221 = vmatpush3.bf16.msra.mxu1 %v2220_v53  ;;  %v459_v21 = vsub.f32 %v2990_v0, %v3963_v10  ;;  %v3039_v29 = vpack.c.bf16 %v341_v24, %v338_v17  ;;  %v220_v24 = vld [vmem:[%s3943_s4 + $0x60] sm:$0xff] }
  0x23   :  { %v453_v49 = vand.u32 4294901760, %v452_v43  ;;  %v3964_v35 = vand.u32 4294901760, %v3017_v23  ;;  %v2222_v12 = vpack.c.bf16 %v572_v45, %v565_v59  ;;  %v3045_v34 = vsub.f32 %v2997_v50, %v296_v11  ;;  %v221_v50 = vld [vmem:[%s3943_s4 + $0x68] sm:$0xff] }
  0x24   :  { %4013 = vst [vmem:[#allocation9_spill] sm:$0xff] %v3039_v29  ;;  %v578_v36 = vsub.f32 %v3008_v7, %v3965_v46  ;;  %v3048_v43 = vsub.f32 %v3002_v51, %v299_v32  ;;  %v460_v53 = vand.u32 4294901760, %v459_v21  ;;  %2191 = vmatprep.subr.bf16.mxu0 %v3039_v29  ;;  %v350_v9 = vand.u32 4294901760, %v3026_v14 }
  0x25   :  { %v585_v10 = vsub.f32 %v3017_v23, %v3964_v35  ;;  %v353_v17 = vand.u32 4294901760, %v3031_v42  ;;  %2223 = vmatprep.subr.bf16.mxu1 %v2222_v12  ;;  %v3969_v59 = vand.u32 4294901760, %v3045_v34  ;;  %v3066_v21 = vpack.c.bf16 %v293_v61, %v290_v56  ;;  %v239_v61 = vld [vmem:[%s3943_s4 + $0xf8] sm:$0xff] }
  0x26   :  { %v579_v51 = vand.u32 4294901760, %v578_v36  ;;  %v3968_v45 = vand.u32 4294901760, %v3048_v43  ;;  %v2224_v35 = vpack.c.bf16 %v460_v53, %v453_v49  ;;  %v3069_v33 = vsub.f32 %v3026_v14, %v350_v9 }
  0x27   :  { %4014 = vst [vmem:[#allocation10_spill] sm:$0xff] %v3066_v21  ;;  %v586_v46 = vand.u32 4294901760, %v585_v10  ;;  %v3072_v25 = vsub.f32 %v3031_v42, %v353_v17  ;;  %v466_v36 = vsub.f32 %v3045_v34, %v3969_v59  ;;  %2193 = vmatpush3.bf16.msra.mxu0 %v3066_v21  ;;  %v302_v20 = vand.u32 4294901760, %v220_v24  ;;  %v238_v10 = vld [vmem:[%s3943_s4 + $0xf0] sm:$0xff] }
  0x28   :  { %4015 = vst [vmem:[#allocation11_spill] sm:$0xff] %v3069_v33  ;;  %v473_v12 = vsub.f32 %v3048_v43, %v3968_v45  ;;  %v305_v56 = vand.u32 4294901760, %v221_v50  ;;  %2225 = vmatpush3.bf16.msra.mxu1 %v2224_v35  ;;  %v3977_v42 = vand.u32 4294901760, %v3069_v33  ;;  %v3089_v53 = vpack.c.bf16 %v347_v1, %v344_v15  ;;  %v222_v1 = vld [vmem:[%s3943_s4 + $0x70] sm:$0xff] }
  0x29   :  { %v2226_v14 = vpack.c.bf16 %v586_v46, %v579_v51  ;;  %v3976_v49 = vand.u32 4294901760, %v3072_v25  ;;  %v467_v45 = vand.u32 4294901760, %v466_v36  ;;  %v3091_v21 = vsub.f32 %v220_v24, %v302_v20  ;;  %v223_v24 = vld [vmem:[%s3943_s4 + $0x78] sm:$0xff] }
  0x2a   :  { %4016 = vst [vmem:[#allocation12_spill] sm:$0xff] %v3089_v53  ;;  %v474_v59 = vand.u32 4294901760, %v473_v12  ;;  %v3093_v29 = vsub.f32 %v221_v50, %v305_v56  ;;  %v592_v18 = vsub.f32 %v3069_v33, %v3977_v42  ;;  %2195 = vmatprep.subr.bf16.mxu0 %v3089_v53  ;;  %v356_v35 = vand.u32 4294901760, %v238_v10 }
  0x2b   :  { %4017 = vst [vmem:[#allocation13_spill] sm:$0xff] %v3091_v21  ;;  %2227 = vmatprep.subr.bf16.mxu1 %v2226_v14  ;;  %v599_v46 = vsub.f32 %v3072_v25, %v3976_v49  ;;  %v359_v15 = vand.u32 4294901760, %v239_v61  ;;  %v3984_v51 = vand.u32 4294901760, %v3091_v21  ;;  %v3110_v12 = vpack.c.bf16 %v299_v32, %v296_v11 }
  0x2c   :  { %4018 = vst [vmem:[#allocation14_spill] sm:$0xff] %v3093_v29  ;;  %v2228_v50 = vpack.c.bf16 %v474_v59, %v467_v45  ;;  %v3985_v36 = vand.u32 4294901760, %v3093_v29  ;;  %v593_v14 = vand.u32 4294901760, %v592_v18  ;;  %v3112_v42 = vsub.f32 %v238_v10, %v356_v35 }
  0x2d   :  { %4019 = vst [vmem:[#allocation15_spill] sm:$0xff] %v3110_v12  ;;  %v600_v49 = vand.u32 4294901760, %v599_v46  ;;  %v3114_v53 = vsub.f32 %v239_v61, %v359_v15  ;;  %v480_v58 = vsub.f32 %v3091_v21, %v3984_v51  ;;  %2197 = vmatpush3.bf16.msra.mxu0 %v3110_v12  ;;  %v308_v45 = vand.u32 4294901760, %v222_v1 }
  0x2e   :  { %4020 = vst [vmem:[#allocation16_spill] sm:$0xff] %v3112_v42  ;;  %2229 = vmatpush3.bf16.msra.mxu1 %v2228_v50  ;;  %v487_v59 = vsub.f32 %v3093_v29, %v3985_v36  ;;  %v311_v11 = vand.u32 4294901760, %v223_v24  ;;  %v605_v18 = vand.u32 4294901760, %v3112_v42  ;;  %v3125_v61 = vpack.c.bf16 %v353_v17, %v350_v9 }
  0x2f   :  { %4021 = vst [vmem:[#allocation17_spill] sm:$0xff] %v3114_v53  ;;  %v2230_v32 = vpack.c.bf16 %v600_v49, %v593_v14  ;;  %v612_v10 = vand.u32 4294901760, %v3114_v53  ;;  %v481_v46 = vand.u32 4294901760, %v480_v58  ;;  %v3127_v40 = vsub.f32 %v222_v1, %v308_v45 }
  0x30   :  { %v488_v50 = vand.u32 4294901760, %v487_v59  ;;  %v3129_v51 = vsub.f32 %v223_v24, %v311_v11  ;;  %v606_v36 = vsub.f32 %v3112_v42, %v605_v18  ;;  %2199 = vmatprep.subr.bf16.mxu0 %v3125_v61  ;;  %v3134_v49 = vpack.c.bf16 %v305_v56, %v302_v20 }
  0x31   :  { %4022 = vst [vmem:[#allocation18_spill] sm:$0xff] %v3127_v40  ;;  %2231 = vmatprep.subr.bf16.mxu1 %v2230_v32  ;;  %v613_v12 = vsub.f32 %v3114_v53, %v612_v10  ;;  %v493_v5 = vand.u32 4294901760, %v3127_v40  ;;  %v3138_v58 = vpack.c.bf16 %v359_v15, %v356_v35  ;;  %v3141_v24 = vpack.c.bf16 %v311_v11, %v308_v45 }
  0x32   :  { %4023 = vst [vmem:[#allocation19_spill] sm:$0xff] %v3129_v51  ;;  %v2232_v14 = vpack.c.bf16 %v488_v50, %v481_v46  ;;  %v500_v9 = vand.u32 4294901760, %v3129_v51  ;;  %v607_v17 = vand.u32 4294901760, %v606_v36  ;;  %2201 = vmatpush3.bf16.msra.mxu0 %v3134_v49  ;;  %v2238_v59 = vpack.c.bf16 %v2708_v26, %v2674_v16 }
  0x33   :  { %v614_v1 = vand.u32 4294901760, %v613_v12  ;;  %v494_v20 = vsub.f32 %v3127_v40, %v493_v5  ;;  %2203 = vmatprep.subr.bf16.mxu0 %v3138_v58  ;;  %v3198_v50 = vpack.c.bf16 %v612_v10, %v605_v18  ;;  %v26_v46 = vsub.s32 0, %v2636_v6 }
  0x34   :  { %2233 = vmatpush3.bf16.msra.mxu1 %v2232_v14  ;;  %v501_v56 = vsub.f32 %v3129_v51, %v500_v9  ;;  %v4031_v14 = vand.u32 4294901760, %v3093_v29 }
  0x35   :  { %v2234_v15 = vpack.c.bf16 %v614_v1, %v607_v17  ;;  %v495_v36 = vand.u32 4294901760, %v494_v20  ;;  %v4025_v1 = vand.u32 4294901760, %v3048_v43  ;;  %v4028_v17 = vand.u32 4294901760, %v3072_v25  ;;  %4033 = vst [vmem:[#allocation23_spill] sm:$0xff] %v3198_v50 }
  0x36   :  { %v502_v12 = vand.u32 4294901760, %v501_v56  ;;  %2205 = vmatpush3.bf16.msra.mxu0 %v3141_v24  ;;  %v4027_v56 = vand.u32 4294901760, %v3069_v33  ;;  %v69_v45 = vrot.slane %v2663_v13, %v26_v46 }
  0x37   :  { %2235 = vmatprep.subr.bf16.mxu1 %v2234_v15  ;;  %2239 = vmatprep.subr.bf16.mxu0 %v2238_v59  ;;  %v4024_v59 = vand.u32 4294901760, %v3045_v34 }
  0x38   :  { %v2236_v11 = vpack.c.bf16 %v502_v12, %v495_v36  ;;  %v3190_v15 = vpack.c.bf16 %v4028_v17, %v4027_v56  ;;  %v4030_v36 = vand.u32 4294901760, %v3091_v21 }
  0x39   :  { %v3184_v20 = vpack.c.bf16 %v4025_v1, %v4024_v59  ;;  %v30_v1 = vsub.s32 1, %v2636_v6  ;;  %v27_v59 = vrot.slane %v2646_v8, %v26_v46 }
  0x3a   :  { %2237 = vmatpush3.bf16.msra.mxu1 %v2236_v11  ;;  %4029 = vst [vmem:[#allocation21_spill] sm:$0xff] %v3190_v15  ;;  %v3196_v12 = vpack.c.bf16 %v4031_v14, %v4030_v36  ;;  %v3200_v11 = vpack.c.bf16 %v500_v9, %v493_v5 }
  0x3b   :  { %2271 = vmatprep.subr.bf16.mxu1 %v2840_v60  ;;  %4026 = vst [vmem:[#allocation20_spill] sm:$0xff] %v3184_v20  ;;  %v31_v32 = vrot.slane %v2646_v8, %v30_v1  ;;  %v73_v10 = vrot.slane %v2663_v13, %v30_v1 }
  0x3c   :  { %4032 = vst [vmem:[#allocation22_spill] sm:$0xff] %v3196_v12  ;;  %4034 = vst [vmem:[#allocation24_spill] sm:$0xff] %v3200_v11 }
  0x81   :  { %v3206_v17 = vpop.permute.xlu0 %46  ;;  %v3208_v56 = vpop.permute.xlu1 %51 }
  0x82   :  { %v54_v14 = vsub.f32 %v27_v59, %v3206_v17  ;;  %v55_v18 = vsub.f32 %v31_v32, %v3206_v17  ;;  %v56_v5 = vsub.f32 %v2679_v19, %v3206_v17  ;;  %v60_v9 = vsub.f32 %v2679_v19, %v3208_v56 }
  0x83   :  { %v58_v36 = vsub.f32 %v27_v59, %v3208_v56  ;;  %v59_v50 = vsub.f32 %v31_v32, %v3208_v56 }
  0x84   :  { %v104_v35 = vmul.f32 %v54_v14, %v54_v14  ;;  %v105_v11 = vmul.f32 %v55_v18, %v55_v18  ;;  %v106_v15 = vmul.f32 %v56_v5, %v56_v5  ;;  %v110_v51 = vmul.f32 %v60_v9, %v60_v9 }
  0x85   :  { %v3220_v12 = vpop.permute.xlu0 %88  ;;  %v3222_v46 = vpop.permute.xlu1 %93  ;;  %v108_v14 = vmul.f32 %v58_v36, %v58_v36  ;;  %v109_v5 = vmul.f32 %v59_v50, %v59_v50 }
  0x86   :  { %v96_v20 = vsub.f32 %v69_v45, %v3220_v12  ;;  %v97_v40 = vsub.f32 %v73_v10, %v3220_v12  ;;  %v98_v1 = vsub.f32 %v2692_v22, %v3220_v12  ;;  %v100_v19 = vsub.f32 %v69_v45, %v3222_v46 }
  0x87   :  { %v101_v59 = vsub.f32 %v73_v10, %v3222_v46  ;;  %v102_v32 = vsub.f32 %v2692_v22, %v3222_v46 }
  0x88   :  { %v112_v18 = vmul.f32 %v96_v20, %v96_v20  ;;  %v113_v26 = vmul.f32 %v97_v40, %v97_v40  ;;  %v114_v16 = vmul.f32 %v98_v1, %v98_v1  ;;  %v116_v42 = vmul.f32 %v100_v19, %v100_v19 }
  0x89   :  { %v117_v53 = vmul.f32 %v101_v59, %v101_v59  ;;  %v118_v21 = vmul.f32 %v102_v32, %v102_v32 }
  0x8a   :  { %v120_v29 = vadd.f32 %v112_v18, %v104_v35  ;;  %v121_v60 = vadd.f32 %v113_v26, %v105_v11  ;;  %v3232_v33 = vadd.f32 %v114_v16, %v106_v15  ;;  %v124_v45 = vadd.f32 %v116_v42, %v108_v14 }
  0x8b   :  { %v3234_v9 = vadd.f32 %v118_v21, %v110_v51  ;;  %v125_v10 = vadd.f32 %v117_v53, %v109_v5 }
  0x8c   :  { %2554 = vrsqrt.f32 %v120_v29  ;;  %vm137_vm0 = vcmp.eq.f32.partialorder %v121_v60, inf  ;;  %vm139_vm1 = vcmp.eq.f32.partialorder %v121_v60, 0.0  ;;  %v140_v36 = vand.u32 2147483648, %v121_v60 }
  0x8d   :  { %2556 = vrsqrt.f32 %v121_v60  ;;  %vm130_vm2 = vcmp.eq.f32.partialorder %v120_v29, inf  ;;  %v133_v35 = vand.u32 2147483648, %v120_v29  ;;  %vm132_vm3 = vcmp.eq.f32.partialorder %v120_v29, 0.0 }
  0x8e   :  { %2558 = vrsqrt.f32 %v124_v45  ;;  %vm165_vm4 = vcmp.eq.f32.partialorder %v125_v10, inf  ;;  %v168_v16 = vand.u32 2147483648, %v125_v10  ;;  %vm158_vm5 = vcmp.eq.f32.partialorder %v124_v45, inf }
  0x8f   :  { %2560 = vrsqrt.f32 %v125_v10  ;;  %v161_v53 = vand.u32 2147483648, %v124_v45  ;;  %vm160_vm6 = vcmp.eq.f32.partialorder %v124_v45, 0.0  ;;  %vm167_vm7 = vcmp.eq.f32.partialorder %v125_v10, 0.0 }
  0x90   :  { %vm144_vm13 = vcmp.eq.f32.partialorder %v3232_v33, inf  ;;  %vm172_vm14 = vcmp.eq.f32.partialorder %v3234_v9, inf  ;;  %vm146_vm15 = vcmp.eq.f32.partialorder %v3232_v33, 0.0 }
  0x96   :  { %v2555_v22 = vpop.eup %2554 }
  0x97   :  { %v2557_v20 = vpop.eup %2556  ;;  %v129_v40 = vmul.f32 %v2555_v22, %v120_v29 }
  0x98   :  { %v136_v50 = vmul.f32 %v2557_v20, %v121_v60  ;;  %v2559_v21 = vpop.eup %2558 }
  0x99   :  { %v131_v26 = vsel %vm130_vm2, %v120_v29, %v129_v40  ;;  %v2561_v15 = vpop.eup %2560  ;;  %v157_v11 = vmul.f32 %v2559_v21, %v124_v45 }
  0x9a   :  { %v138_v51 = vsel %vm137_vm0, %v121_v60, %v136_v50  ;;  %v134_v42 = vsel %vm132_vm3, %v133_v35, %v131_v26  ;;  %v164_v59 = vmul.f32 %v2561_v15, %v125_v10  ;;  %v38_v35 = vsub.s32 3, %v2636_v6 }
  0x9b   :  { %v141_v1 = vsel %vm139_vm1, %v140_v36, %v138_v51  ;;  %v184_v19 = vsub.f32 0.0, %v134_v42  ;;  %v159_v18 = vsel %vm158_vm5, %v124_v45, %v157_v11  ;;  %vm174_vm0 = vcmp.eq.f32.partialorder %v3234_v9, 0.0 }
  0x9c   :  { %v185_v32 = vsub.f32 0.0, %v141_v1  ;;  %v166_v29 = vsel %vm165_vm4, %v125_v10, %v164_v59  ;;  %v162_v22 = vsel %vm160_vm6, %v161_v53, %v159_v18  ;;  %v3240_v26 = vrot.slane %v2663_v13, %v38_v35 }
  0x9d   :  { %v192_v14 = vmul.f32 1.442695, %v184_v19  ;;  %v169_v20 = vsel %vm167_vm7, %v168_v16, %v166_v29  ;;  %v188_v40 = vsub.f32 0.0, %v162_v22  ;;  %v3243_v45 = vrot.slane %v2646_v8, %v38_v35  ;;  %v4035_v35 = vld [vmem:[#allocation5_spill] sm:$0xff] }
  0x9e   :  { %v194_v5 = vmul.f32 1.442695, %v185_v32  ;;  %v189_v50 = vsub.f32 0.0, %v169_v20  ;;  %v99_v10 = vsub.f32 %v3240_v26, %v3220_v12  ;;  %vm1939_vm1 = vcmask 7168  }
  0x9f   :  { %2562 = vpow2.f32 %v192_v14  ;;  %v200_v60 = vmul.f32 1.442695, %v188_v40  ;;  %v57_v16 = vsub.f32 %v3243_v45, %v3206_v17 }
  0xa0   :  { %2564 = vpow2.f32 %v194_v5  ;;  %v202_v36 = vmul.f32 1.442695, %v189_v50  ;;  %v115_v6 = vmul.f32 %v99_v10, %v99_v10 }
  0xa1   :  { %2566 = vpow2.f32 %v200_v60  ;;  %v107_v11 = vmul.f32 %v57_v16, %v57_v16  ;;  %v4037_v16 = vld [vmem:[#allocation6_spill] sm:$0xff] }
  0xa2   :  { %2568 = vpow2.f32 %v202_v36 }
  0xa3   :  { %v123_v19 = vadd.f32 %v115_v6, %v107_v11  ;;  %v4038_v6 = vpack.c.bf16 %v2738_v38, %v2733_v37  ;;  %v4040_v11 = vpack.c.bf16 %v2759_v44, %v2743_v39 }
  0xa5   :  { %2570 = vrsqrt.f32 %v123_v19  ;;  %vm151_vm8 = vcmp.eq.f32.partialorder %v123_v19, inf  ;;  %vm153_vm9 = vcmp.eq.f32.partialorder %v123_v19, 0.0 }
  0xa9   :  { %v2563_v21 = vpop.eup %2562 }
  0xaa   :  { %v2565_v51 = vpop.eup %2564  ;;  %v3249_v42 = vand.u32 4294901760, %v2563_v21 }
  0xab   :  { %v3251_v53 = vand.u32 4294901760, %v2565_v51  ;;  %v2567_v15 = vpop.eup %2566 }
  0xac   :  { %v3254_v13 = vsub.f32 %v2563_v21, %v3249_v42  ;;  %v2569_v12 = vpop.eup %2568  ;;  %v3259_v1 = vand.u32 4294901760, %v2567_v15  ;;  %v4036_v21 = vpack.c.bf16 %v2718_v28, %v2713_v27 }
  0xad   :  { %617 = vmatprep.mubr.f32.mxu1 %v3251_v53  ;;  %v362_v8 = vsub.f32 %v2565_v51, %v3251_v53  ;;  %v3263_v59 = vand.u32 4294901760, %v2569_v12 }
  0xae   :  { %619 = vmatmul.mubr.f32.vlgmr.msra.gmra.mrb[0].mxu1 %v3249_v42  ;;  %v369_v17 = vand.u32 4294901760, %v3254_v13  ;;  %v3270_v18 = vsub.f32 %v2567_v15, %v3259_v1  ;;  %v4039_v15 = vld [vmem:[#allocation7_spill] sm:$0xff] }
  0xaf   :  { %2273 = vmatpush3.bf16.msra.mxu1 %v2872_v63  ;;  %v363_v32 = vand.u32 4294901760, %v362_v8  ;;  %624 = vmatprep.mubr.f32.mxu1 %v3263_v59  ;;  %v3274_v29 = vsub.f32 %v2569_v12, %v3263_v59  ;;  %v4041_v12 = vld [vmem:[#allocation8_spill] sm:$0xff] }
  0xb0   :  { %2275 = vmatprep.subr.bf16.mxu1 %v2893_v54  ;;  %v370_v14 = vsub.f32 %v3254_v13, %v369_v17  ;;  %v384_v20 = vand.u32 4294901760, %v3270_v18 }
  0xb1   :  { %v364_v5 = vsub.f32 %v362_v8, %v363_v32  ;;  %v378_v50 = vand.u32 4294901760, %v3274_v29 }
  0xb2   :  { %626 = vmatmul.mubr.f32.gmra.mrb[2].mxu1 %v3259_v1  ;;  %v371_v22 = vand.u32 4294901760, %v370_v14  ;;  %v385_v60 = vsub.f32 %v3270_v18, %v384_v20  ;;  %v2571_v14 = vpop.eup %2570 }
  0xb3   :  { %2277 = vmatpush3.bf16.msra.mxu1 %v2915_v30  ;;  %877 = vmatprep.mubr.f32.mxu1 %v363_v32  ;;  %v365_v40 = vand.u32 4294901760, %v364_v5  ;;  %v379_v36 = vsub.f32 %v3274_v29, %v378_v50  ;;  %v4042_v32 = vpack.c.bf16 %v2816_v41, %v2795_v62  ;;  %v4043_v5 = vld [vmem:[#allocation9_spill] sm:$0xff] }
  0xb4   :  { %2279 = vmatprep.subr.bf16.mxu1 %v4035_v35  ;;  %v386_v10 = vand.u32 4294901760, %v385_v60  ;;  %v150_v60 = vmul.f32 %v2571_v14, %v123_v19  ;;  %v103_v14 = vsub.f32 %v3240_v26, %v3222_v46  ;;  %v4054_v46 = vld [vmem:[#allocation11_spill] sm:$0xff] }
  0xb5   :  { %366 = vmatprep.mubr.f32.mxu0 %v365_v40  ;;  %v380_v51 = vand.u32 4294901760, %v379_v36  ;;  %v4045_v40 = vld [vmem:[#allocation10_spill] sm:$0xff]  ;;  %v4046_v36 = vpack.c.bf16 %v2853_v4, %v2848_v3  ;;  %v4055_v26 = vpack.c.bf16 %v3072_v25, %v4054_v46 }
  0xb6   :  { %372 = vmatmul.mubr.f32.vlgmr.msra.gmra.mrb[0].mxu0 %v371_v22  ;;  %v4044_v22 = vpack.c.bf16 %v2843_v2, %v2829_v57  ;;  %v4063_v25 = vld [vmem:[#allocation2_spill] sm:$0xff] }
  0xb7   :  { %2241 = vmatpush3.bf16.msra.mxu0 %v4036_v21  ;;  %2281 = vmatpush3.bf16.msra.mxu1 %v4037_v16  ;;  %v4049_v21 = vld [vmem:[#allocation15_spill] sm:$0xff] }
  0xb8   :  { %2243 = vmatprep.subr.bf16.mxu0 %v4038_v6  ;;  %2283 = vmatprep.subr.bf16.mxu1 %v4039_v15  ;;  %v152_v6 = vsel %vm151_vm8, %v123_v19, %v150_v60 }
  0xb9   :  { %381 = vmatprep.mubr.f32.mxu0 %v380_v51  ;;  %v4050_v51 = vpack.c.bf16 %v2955_v48, %v2930_v31 }
  0xba   :  { %387 = vmatmul.mubr.f32.gmra.mrb[2].mxu0 %v386_v10  ;;  %v4047_v10 = vld [vmem:[#allocation12_spill] sm:$0xff] }
  0xbb   :  { %2245 = vmatpush3.bf16.msra.mxu0 %v4040_v11  ;;  %2285 = vmatpush3.bf16.msra.mxu1 %v4041_v12  ;;  %v154_v11 = vand.u32 2147483648, %v123_v19 }
  0xbc   :  { %761 = vmatprep.mubr.f32.mxu0 %v362_v8  ;;  %2247 = vmatprep.subr.bf16.mxu0 %v4042_v32  ;;  %v4048_v8 = vpack.c.bf16 %v2922_v47, %v2918_v55  ;;  %v61_v32 = vsub.f32 %v3243_v45, %v3208_v56  ;;  %v4053_v56 = vpack.c.bf16 %v3048_v43, %v3045_v34  ;;  %v4056_v45 = vld [vmem:[#allocation4_spill] sm:$0xff]  ;;  %v4060_v34 = vld [vmem:[#allocation17_spill] sm:$0xff] }
  0xbd   :  { %2287 = vmatprep.subr.bf16.mxu1 %v4043_v5  ;;  %v4061_v43 = vld [vmem:[#allocation16_spill] sm:$0xff] }
  0xbe   :  { %v111_v60 = vmul.f32 %v61_v32, %v61_v32  ;;  %v4057_v32 = vld [vmem:[#allocation14_spill] sm:$0xff] }
  0xbf   :  { %2249 = vmatpush3.bf16.msra.mxu0 %v4044_v22  ;;  %2289 = vmatpush3.bf16.msra.mxu1 %v4045_v40  ;;  %v4051_v22 = vpack.c.bf16 %v2990_v0, %v2974_v52 }
  0xc0   :  { %2251 = vmatprep.subr.bf16.mxu0 %v4046_v36  ;;  %2291 = vmatprep.subr.bf16.mxu1 %v4047_v10  ;;  %v155_v36 = vsel %vm153_vm9, %v154_v11, %v152_v6 }
  0xc1   :  { %v187_v19 = vsub.f32 0.0, %v155_v36  ;;  %v4062_v36 = vpack.c.bf16 %v4060_v34, %v4061_v43 }
  0xc3   :  { %2253 = vmatpush3.bf16.msra.mxu0 %v4048_v8  ;;  %2293 = vmatpush3.bf16.msra.mxu1 %v4049_v21  ;;  %v4052_v8 = vpack.c.bf16 %v3017_v23, %v3008_v7  ;;  %v198_v6 = vmul.f32 1.442695, %v187_v19  ;;  %v4068_v19 = vld [vmem:[#allocation18_spill] sm:$0xff] }
  0xc4   :  { %2255 = vmatprep.subr.bf16.mxu0 %v4050_v51  ;;  %2295 = vmatprep.subr.bf16.mxu1 %v3125_v61  ;;  %v119_v51 = vmul.f32 %v103_v14, %v103_v14  ;;  %v4058_v14 = vld [vmem:[#allocation13_spill] sm:$0xff] }
  0xc5   :  { %2572 = vpow2.f32 %v198_v6 }
  0xc6   :  { %v3337_v11 = vadd.f32 %v119_v51, %v111_v60  ;;  %v4071_v60 = vand.u32 4294901760, %v2718_v28  ;;  %v4075_v28 = vand.u32 4294901760, %v2759_v44  ;;  %v4079_v44 = vand.u32 4294901760, %v2843_v2 }
  0xc7   :  { %2257 = vmatpush3.bf16.msra.mxu0 %v4051_v22  ;;  %2297 = vmatpush3.bf16.msra.mxu1 %v3134_v49  ;;  %v4059_v22 = vpack.c.bf16 %v4057_v32, %v4058_v14  ;;  %v4083_v2 = vand.u32 4294901760, %v2922_v47 }
  0xc8   :  { %2259 = vmatprep.subr.bf16.mxu0 %v4052_v8  ;;  %2299 = vmatprep.subr.bf16.mxu1 %v3138_v58  ;;  %v4064_v8 = vand.u32 4294901760, %v4063_v25  ;;  %2574 = vrsqrt.f32 %v3337_v11  ;;  %vm179_vm11 = vcmp.eq.f32.partialorder %v3337_v11, inf  ;;  %v182_v14 = vand.u32 2147483648, %v3337_v11 }
  0xc9   :  { %2576 = vrsqrt.f32 %v3232_v33  ;;  %vm181_vm12 = vcmp.eq.f32.partialorder %v3337_v11, 0.0 }
  0xca   :  { %2578 = vrsqrt.f32 %v3234_v9 }
  0xcb   :  { %2261 = vmatpush3.bf16.msra.mxu0 %v4053_v56  ;;  %2301 = vmatpush3.bf16.msra.mxu1 %v3141_v24  ;;  %v4065_v56 = vld [vmem:[#allocation3_spill] sm:$0xff] }
  0xcc   :  { %2263 = vmatprep.subr.bf16.mxu0 %v4055_v26  ;;  %2335 = vmatprep.subr.bf16.mxu1 %v4056_v45  ;;  %v4066_v46 = vand.u32 4294901760, %v4065_v56  ;;  %v3447_v56 = vld [vmem:[%s3943_s4 + $0x110] sm:$0xff] }
  0xce   :  { %881 = vmatmul.mubr.f32.vlgmr.msra.gmra.mrb[4].mxu1 %v369_v17  ;;  %v2302_v26 = vpack.c.bf16 %v4066_v46, %v4064_v8  ;;  %v4067_v17 = vld [vmem:[#allocation19_spill] sm:$0xff]  ;;  %v3452_v46 = vld [vmem:[%s3943_s4 + $0x118] sm:$0xff] }
  0xcf   :  { %2265 = vmatpush3.bf16.msra.mxu0 %v4059_v22  ;;  %888 = vmatprep.mubr.f32.mxu1 %v378_v50  ;;  %v4069_v50 = vpack.c.bf16 %v4067_v17, %v4068_v19  ;;  %v4087_v22 = vand.u32 4294901760, %v2990_v0  ;;  %v3430_v0 = vld [vmem:[%s3943_s4 + $0x108] sm:$0xff] }
  0xd0   :  { %2337 = vmatpush3.bf16.msra.mxu1 %v2872_v63  ;;  %2267 = vmatprep.subr.bf16.mxu0 %v4062_v36  ;;  %v4070_v63 = vand.u32 4294901760, %v2713_v27  ;;  %v4074_v27 = vand.u32 4294901760, %v2743_v39  ;;  %v4078_v39 = vand.u32 4294901760, %v2829_v57  ;;  %v4082_v57 = vand.u32 4294901760, %v2918_v55 }
  0xd1   :  { %2339 = vmatprep.subr.bf16.mxu1 %v2893_v54  ;;  %v4072_v54 = vand.u32 4294901760, %v2733_v37  ;;  %v4076_v37 = vand.u32 4294901760, %v2795_v62  ;;  %v4080_v62 = vand.u32 4294901760, %v2848_v3  ;;  %v4084_v3 = vand.u32 4294901760, %v2930_v31 }
  0xd2   :  { %892 = vmatmul.mubr.f32.gmra.mrb[6].mxu1 %v384_v20  ;;  %v2304_v51 = vpack.c.bf16 %v4071_v60, %v4070_v63  ;;  %v4073_v20 = vand.u32 4294901760, %v2738_v38  ;;  %v4077_v38 = vand.u32 4294901760, %v2816_v41  ;;  %v4081_v41 = vand.u32 4294901760, %v2853_v4 }
  0xd3   :  { %2269 = vmatpush3.bf16.msra.mxu0 %v4069_v50  ;;  %1169 = vmatprep.mubr.f32.mxu1 %v3251_v53  ;;  %v4085_v4 = vand.u32 4294901760, %v2955_v48  ;;  %v4088_v48 = vand.u32 4294901760, %v3008_v7  ;;  %v1187_v25 = vand.u32 4294901760, %v3430_v0  ;;  %v4091_v50 = vld [vmem:[#allocation21_spill] sm:$0xff]  ;;  %v1190_v60 = vand.u32 4294901760, %v3447_v56 }
  0xd4   :  { %2341 = vmatpush3.bf16.msra.mxu1 %v2915_v30  ;;  %2303 = vmatprep.subr.bf16.mxu0 %v2302_v26  ;;  %v2306_v45 = vpack.c.bf16 %v4073_v20, %v4072_v54  ;;  %v2308_v30 = vpack.c.bf16 %v4075_v28, %v4074_v27  ;;  %v2310_v6 = vpack.c.bf16 %v4077_v38, %v4076_v37  ;;  %v2591_v54 = vmov 0.0|0.0   ;;  %v4092_v28 = vld [vmem:[#allocation22_spill] sm:$0xff] }
  0xd5   :  { %2343 = vmatprep.subr.bf16.mxu1 %v4035_v35  ;;  %v2314_v35 = vpack.c.bf16 %v4081_v41, %v4080_v62  ;;  %v2318_v32 = vpack.c.bf16 %v4085_v4, %v4084_v3  ;;  %v4094_v41 = vld [vmem:[#allocation24_spill] sm:$0xff] }
  0xd6   :  { %764 = vmatmul.mubr.f32.vlgmr.msra.gmra.mrb[4].mxu0 %v3254_v13  ;;  %v2312_v13 = vpack.c.bf16 %v4079_v44, %v4078_v39  ;;  %v4093_v44 = vld [vmem:[#allocation23_spill] sm:$0xff] }
  0xd7   :  { %770 = vmatprep.mubr.f32.mxu0 %v3274_v29  ;;  %2305 = vmatpush3.bf16.msra.mxu0 %v2304_v51  ;;  %v2573_v29 = vpop.eup %2572  ;;  %v1193_v51 = vand.u32 4294901760, %v3452_v46 }
  0xd8   :  { %2345 = vmatpush3.bf16.msra.mxu1 %v4037_v16  ;;  %2307 = vmatprep.subr.bf16.mxu0 %v2306_v45  ;;  %v2575_v16 = vpop.eup %2574 }
  0xd9   :  { %2347 = vmatprep.subr.bf16.mxu1 %v4039_v15  ;;  %v260_v15 = vsel %vm258_vm10, %v2573_v29, 0  ;;  %v3491_v38 = vpack.c.bf16 %v1193_v51, %v1190_v60  ;;  %v3503_v29 = vld [vmem:[%s3943_s4 + $0x138] sm:$0xff] }
  0xda   :  { %773 = vmatmul.mubr.f32.gmra.mrb[6].mxu0 %v3270_v18  ;;  %v2577_v18 = vpop.eup %2576  ;;  %v3406_v47 = vand.u32 4294901760, %v260_v15 }
  0xdb   :  { %2309 = vmatpush3.bf16.msra.mxu0 %v2308_v30  ;;  %1058 = vmatprep.mubr.f32.mxu0 %v3251_v53  ;;  %v2316_v53 = vpack.c.bf16 %v4083_v2, %v4082_v57  ;;  %v143_v55 = vmul.f32 %v2577_v18, %v3232_v33  ;;  %v1205_v18 = vand.u32 4294901760, %v3503_v29  ;;  %v3521_v2 = vld [vmem:[%s3943_s4 + $0x140] sm:$0xff] }
  0xdc   :  { %2349 = vmatpush3.bf16.msra.mxu1 %v4041_v12  ;;  %2311 = vmatprep.subr.bf16.mxu0 %v2310_v6  ;;  %v178_v12 = vmul.f32 %v2575_v16, %v3337_v11 }
  0xdd   :  { %2351 = vmatprep.subr.bf16.mxu1 %v4043_v5  ;;  %v2579_v5 = vpop.eup %2578 }
  0xde   :  { %v180_v43 = vsel %vm179_vm11, %v3337_v11, %v178_v12  ;;  %v171_v7 = vmul.f32 %v2579_v5, %v3234_v9  ;;  %v147_v11 = vand.u32 2147483648, %v3232_v33  ;;  %v1208_v12 = vand.u32 4294901760, %v3521_v2 }
  0xdf   :  { %2313 = vmatpush3.bf16.msra.mxu0 %v2312_v13  ;;  %v3498_v13 = vld [vmem:[%s3943_s4 + $0x130] sm:$0xff] }
  0xe0   :  { %2353 = vmatpush3.bf16.msra.mxu1 %v4045_v40  ;;  %2315 = vmatprep.subr.bf16.mxu0 %v2314_v35  ;;  %v4086_v40 = vand.u32 4294901760, %v2974_v52  ;;  %v3425_v52 = vld [vmem:[%s3943_s4 + $0x100] sm:$0xff]  ;;  %v173_v17 = vsel %vm172_vm14, %v3234_v9, %v171_v7  ;;  %v1202_v16 = vand.u32 4294901760, %v3498_v13 }
  0xe1   :  { %2355 = vmatprep.subr.bf16.mxu1 %v4047_v10  ;;  %v4089_v10 = vand.u32 4294901760, %v3017_v23  ;;  %v145_v23 = vsel %vm144_vm13, %v3232_v33, %v143_v55  ;;  %v1184_v36 = vand.u32 4294901760, %v3425_v52  ;;  %v175_v33 = vand.u32 2147483648, %v3234_v9  ;;  %v3472_v9 = vld [vmem:[%s3943_s4 + $0x120] sm:$0xff] }
  0xe2   :  { %v2320_v31 = vpack.c.bf16 %v4087_v22, %v4086_v40  ;;  %v148_v8 = vsel %vm146_vm15, %v147_v11, %v145_v23  ;;  %v1196_v30 = vand.u32 4294901760, %v3472_v9 }
  0xe3   :  { %2317 = vmatpush3.bf16.msra.mxu0 %v2316_v53  ;;  %v2322_v34 = vpack.c.bf16 %v4089_v10, %v4088_v48  ;;  %v186_v19 = vsub.f32 0.0, %v148_v8  ;;  %v3465_v63 = vpack.c.bf16 %v1187_v25, %v1184_v36  ;;  %v176_v20 = vsel %vm174_vm0, %v175_v33, %v173_v17  ;;  %v3526_v53 = vld [vmem:[%s3943_s4 + $0x148] sm:$0xff]  ;;  %v3636_v33 = vld [vmem:[%s3943_s4 + $0x180] sm:$0xff] }
  0xe4   :  { %2357 = vmatpush3.bf16.msra.mxu1 %v4049_v21  ;;  %2319 = vmatprep.subr.bf16.mxu0 %v2318_v32  ;;  %v3435_v21 = vsub.f32 %v260_v15, %v3406_v47  ;;  %v190_v39 = vsub.f32 0.0, %v176_v20  ;;  %v3537_v15 = vpack.c.bf16 %v1205_v18, %v1202_v16  ;;  %v1211_v3 = vand.u32 4294901760, %v3526_v53 }
  0xe5   :  { %2359 = vmatprep.subr.bf16.mxu1 %v3125_v61  ;;  %v183_v61 = vsel %vm181_vm12, %v182_v14, %v180_v43  ;;  %v196_v6 = vmul.f32 1.442695, %v186_v19  ;;  %v3573_v14 = vld [vmem:[%s3943_s4 + $0x168] sm:$0xff]  ;;  %v3578_v22 = vsub.f32 %v3425_v52, %v1184_v36  ;;  %v3585_v48 = vsub.f32 %v3430_v0, %v1187_v25  ;;  %v3600_v52 = vld [vmem:[%s3943_s4 + $0x170] sm:$0xff]  ;;  %v3605_v0 = vld [vmem:[%s3943_s4 + $0x178] sm:$0xff] }
  0xe6   :  { %v191_v26 = vsub.f32 0.0, %v183_v61  ;;  %v204_v57 = vmul.f32 1.442695, %v190_v39  ;;  %v3560_v32 = vpack.c.bf16 %v1211_v3, %v1208_v12  ;;  %v1223_v43 = vand.u32 4294901760, %v3573_v14 }
  0xe7   :  { %2321 = vmatpush3.bf16.msra.mxu0 %v2320_v31  ;;  %v3615_v61 = vsub.f32 %v3447_v56, %v1190_v60  ;;  %v1226_v36 = vand.u32 4294901760, %v3600_v52  ;;  %v4002_v25 = vand.u32 4294901760, %v3605_v0  ;;  %v3623_v8 = vsub.f32 %v3452_v46, %v1193_v51  ;;  %v3641_v46 = vld [vmem:[%s3943_s4 + $0x188] sm:$0xff] }
  0xe8   :  { %2361 = vmatpush3.bf16.msra.mxu1 %v3134_v49  ;;  %2323 = vmatprep.subr.bf16.mxu0 %v2322_v34  ;;  %v1267_v49 = vand.u32 4294901760, %v3435_v21  ;;  %v206_v27 = vmul.f32 1.442695, %v191_v26  ;;  %v1306_v26 = vand.u32 4294901760, %v3585_v48  ;;  %v3654_v19 = vsub.f32 %v3472_v9, %v1196_v30 }
  0xe9   :  { %2363 = vmatprep.subr.bf16.mxu1 %v3138_v58  ;;  %v4090_v58 = vld [vmem:[#allocation20_spill] sm:$0xff]  ;;  %v3669_v51 = vpack.c.bf16 %v4002_v25, %v1226_v36  ;;  %v4001_v20 = vand.u32 4294901760, %v3636_v33  ;;  %v4000_v9 = vand.u32 4294901760, %v3641_v46 }
  0xea   :  { %v1268_v45 = vsub.f32 %v3435_v21, %v1267_v49  ;;  %2580 = vpow2.f32 %v206_v27  ;;  %v1313_v27 = vand.u32 4294901760, %v3615_v61 }
  0xeb   :  { %2325 = vmatpush3.bf16.msra.mxu0 %v4090_v58  ;;  %2582 = vpow2.f32 %v196_v6  ;;  %v3691_v6 = vsub.f32 %v3498_v13, %v1202_v16 }
  0xec   :  { %2365 = vmatpush3.bf16.msra.mxu1 %v3141_v24  ;;  %2327 = vmatprep.subr.bf16.mxu0 %v4091_v50  ;;  %v3477_v24 = vld [vmem:[%s3943_s4 + $0x128] sm:$0xff]  ;;  %v1269_v62 = vand.u32 4294901760, %v1268_v45  ;;  %2584 = vpow2.f32 %v204_v57  ;;  %v1307_v45 = vsub.f32 %v3585_v48, %v1306_v26 }
  0xed   :  { %2366 = vmatprep.subr.bf16.mxu1 %v2591_v54  ;;  %v1199_v37 = vand.u32 4294901760, %v3477_v24 }
  0xee   :  { %v1308_v57 = vand.u32 4294901760, %v1307_v45 }
  0xef   :  { %1171 = vmatmul.mubr.f32.vlgmr.msra.gmra.mrb[8].mxu1 %v3249_v42  ;;  %2329 = vmatpush3.bf16.msra.mxu0 %v4092_v28  ;;  %v3511_v35 = vpack.c.bf16 %v1199_v37, %v1196_v30  ;;  %v3662_v60 = vsub.f32 %v3477_v24, %v1199_v37  ;;  %v1320_v28 = vand.u32 4294901760, %v3623_v8 }
  0xf0   :  { %1176 = vmatprep.mubr.f32.mxu1 %v3263_v59  ;;  %2368 = vmatpush1.bf16.msra.mxu1 %v3465_v63 }
  0xf1   :  { %2331 = vmatprep.subr.bf16.mxu0 %v4093_v44  ;;  %2369 = vmatprep.subr.bf16.mxu1 %v2591_v54  ;;  %v3697_v44 = vsub.f32 %v3503_v29, %v1205_v18  ;;  %v4004_v13 = vand.u32 4294901760, %v3662_v60  ;;  %v1314_v29 = vsub.f32 %v3615_v61, %v1313_v27  ;;  %v1321_v18 = vsub.f32 %v3623_v8, %v1320_v28 }
  0xf3   :  { %1178 = vmatmul.mubr.f32.gmra.mrb[10].mxu1 %v3259_v1  ;;  %2333 = vmatpush3.bf16.msra.mxu0 %v4094_v41  ;;  %v4003_v41 = vand.u32 4294901760, %v3654_v19 }
  0xf4   :  { %2371 = vmatpush1.bf16.msra.mxu1 %v3491_v38  ;;  %1270 = vmatprep.mubr.f32.mxu1 %v1269_v62  ;;  %v2581_v4 = vpop.eup %2580  ;;  %v3704_v62 = vpack.c.bf16 %v4000_v9, %v4001_v20  ;;  %v1315_v20 = vand.u32 4294901760, %v1314_v29 }
  0xf5   :  { %2372 = vmatprep.subr.bf16.mxu1 %v2591_v54  ;;  %2447 = vmatprep.subr.bf16.mxu0 %v2591_v54  ;;  %v2583_v40 = vpop.eup %2582  ;;  %v263_v31 = vsel %vm258_vm10, %v2581_v4, 0  ;;  %v1328_v45 = vsub.f32 %v3654_v19, %v4003_v41 }
  0xf6   :  { %1060 = vmatmul.mubr.f32.vlgmr.msra.gmra.mrb[8].mxu0 %v3249_v42  ;;  %v3545_v42 = vld [vmem:[%s3943_s4 + $0x150] sm:$0xff]  ;;  %v3608_v23 = vand.u32 4294901760, %v2583_v40  ;;  %v2585_v7 = vpop.eup %2584  ;;  %v3610_v11 = vand.u32 4294901760, %v263_v31 }
  0xf7   :  { %1065 = vmatprep.mubr.f32.mxu0 %v3263_v59  ;;  %2449 = vmatpush1.bf16.msra.mxu0 %v3465_v63  ;;  %v3550_v59 = vld [vmem:[%s3943_s4 + $0x158] sm:$0xff]  ;;  %v1214_v55 = vand.u32 4294901760, %v3545_v42  ;;  %v3649_v58 = vand.u32 4294901760, %v2585_v7 }
  0xf8   :  { %2374 = vmatpush1.bf16.msra.mxu1 %v3511_v35  ;;  %2450 = vmatprep.subr.bf16.mxu0 %v2591_v54  ;;  %v1217_v5 = vand.u32 4294901760, %v3550_v59  ;;  %v3647_v17 = vsub.f32 %v2583_v40, %v3608_v23  ;;  %v3657_v50 = vsub.f32 %v263_v31, %v3610_v11  ;;  %v3724_v31 = vsub.f32 %v3521_v2, %v1208_v12 }
  0xf9   :  { %2375 = vmatprep.subr.bf16.mxu1 %v2591_v54  ;;  %v3686_v37 = vsub.f32 %v2585_v7, %v3649_v58  ;;  %v1335_v2 = vsub.f32 %v3662_v60, %v4004_v13  ;;  %v1341_v12 = vand.u32 4294901760, %v3691_v6  ;;  %v3752_v13 = vsub.f32 %v3545_v42, %v1214_v55 }
  0xfa   :  { %1067 = vmatmul.mubr.f32.gmra.mrb[10].mxu0 %v3259_v1  ;;  %v3568_v1 = vld [vmem:[%s3943_s4 + $0x160] sm:$0xff]  ;;  %v3593_v10 = vpack.c.bf16 %v1217_v5, %v1214_v55  ;;  %v1273_v30 = vand.u32 4294901760, %v3647_v17  ;;  %v4005_v39 = vand.u32 4294901760, %v3657_v50  ;;  %v1355_v55 = vand.u32 4294901760, %v3724_v31  ;;  %s2592_s4 = smov 1  }
  0xfb   :  { %2452 = vmatpush1.bf16.msra.mxu0 %v3491_v38  ;;  %1669 = vmatprep.mubr.f32.mxu0 %v1267_v49  ;;  %v1220_v34 = vand.u32 4294901760, %v3568_v1  ;;  %v1299_v49 = vand.u32 4294901760, %v3578_v22  ;;  %v1288_v40 = vand.u32 4294901760, %v3686_v37  ;;  %v1336_v29 = vand.u32 4294901760, %v1335_v2 }
  0xfc   :  { %2377 = vmatpush1.bf16.msra.mxu1 %v3537_v15  ;;  %2453 = vmatprep.subr.bf16.mxu0 %v2591_v54  ;;  %v1274_v4 = vsub.f32 %v3647_v17, %v1273_v30  ;;  %v1283_v7 = vsub.f32 %v3657_v50, %v4005_v39 }
  0xfd   :  { %2378 = vmatprep.subr.bf16.mxu1 %v2591_v54  ;;  %v3631_v56 = vpack.c.bf16 %v1223_v43, %v1220_v34  ;;  %v1300_v24 = vsub.f32 %v3578_v22, %v1299_v49  ;;  %v1289_v41 = vsub.f32 %v3686_v37, %v1288_v40 }
  0xfe   :  { %v1275_v25 = vand.u32 4294901760, %v1274_v4  ;;  %v1284_v39 = vand.u32 4294901760, %v1283_v7 }
  0xff   :  { %2455 = vmatpush1.bf16.msra.mxu0 %v3511_v35  ;;  %v1301_v16 = vand.u32 4294901760, %v1300_v24  ;;  %v3732_v24 = vsub.f32 %v3526_v53, %v1211_v3  ;;  %v1322_v53 = vand.u32 4294901760, %v1321_v18  ;;  %v1348_v3 = vand.u32 4294901760, %v3697_v44 }
 0x100   :  { %2380 = vmatpush1.bf16.msra.mxu1 %v3560_v32  ;;  %2456 = vmatprep.subr.bf16.mxu0 %v2591_v54  ;;  %v1342_v18 = vsub.f32 %v3691_v6, %v1341_v12 }
 0x101   :  { %2381 = vmatprep.subr.bf16.mxu1 %v2591_v54  ;;  %v2394_v9 = vpack.c.bf16 %v1308_v57, %v1301_v16  ;;  %v3757_v16 = vsub.f32 %v3550_v59, %v1217_v5  ;;  %v1329_v57 = vand.u32 4294901760, %v1328_v45  ;;  %v2397_v4 = vpack.c.bf16 %v1322_v53, %v1315_v20 }
 0x102   :  { %v1349_v42 = vsub.f32 %v3697_v44, %v1348_v3  ;;  %v1362_v59 = vand.u32 4294901760, %v3732_v24  ;;  %v1290_v5 = vand.u32 4294901760, %v1289_v41  ;;  %v3778_v20 = vsub.f32 %v3573_v14, %v1223_v43 }
 0x103   :  { %2458 = vmatpush1.bf16.msra.mxu0 %v3537_v15  ;;  %v1369_v41 = vand.u32 4294901760, %v3752_v13  ;;  %v1376_v7 = vand.u32 4294901760, %v3757_v16  ;;  %v1356_v14 = vsub.f32 %v3724_v31, %v1355_v55  ;;  %v4095_v45 = vand.u32 4294901760, %v3657_v50 }
 0x104   :  { %2383 = vmatpush1.bf16.msra.mxu1 %v3593_v10  ;;  %2459 = vmatprep.subr.bf16.mxu0 %v2591_v54  ;;  %v1363_v43 = vsub.f32 %v3732_v24, %v1362_v59  ;;  %v4096_v53 = vand.u32 4294901760, %v3605_v0 }
 0x105   :  { %2384 = vmatprep.subr.bf16.mxu1 %v2591_v54  ;;  %v1370_v2 = vsub.f32 %v3752_v13, %v1369_v41 }
 0x107   :  { %2461 = vmatpush1.bf16.msra.mxu0 %v3560_v32 }
 0x108   :  { %2386 = vmatpush1.bf16.msra.mxu1 %v3631_v56  ;;  %2462 = vmatprep.subr.bf16.mxu0 %v2591_v54 }
 0x109   :  { %2387 = vmatprep.subr.bf16.mxu1 %v2591_v54 }
 0x10b   :  { %2464 = vmatpush1.bf16.msra.mxu0 %v3593_v10 }
 0x10c   :  { %2389 = vmatpush1.bf16.msra.mxu1 %v3669_v51  ;;  %2465 = vmatprep.subr.bf16.mxu0 %v2591_v54 }
 0x10d   :  { %2390 = vmatprep.subr.bf16.mxu1 %v2591_v54 }
 0x10f   :  { %2467 = vmatpush1.bf16.msra.mxu0 %v3631_v56 }
 0x110   :  { %2392 = vmatpush1.bf16.msra.mxu1 %v3704_v62  ;;  %2468 = vmatprep.subr.bf16.mxu0 %v2591_v54 }
 0x111   :  { %2393 = vmatprep.subr.bf16.mxu1 %v2591_v54 }
 0x113   :  { %1276 = vmatmul.mubr.f32.vlgmr.msra.gmra.mrb[12].mxu1 %v1275_v25  ;;  %2470 = vmatpush1.bf16.msra.mxu0 %v3669_v51  ;;  %v3773_v25 = vsub.f32 %v3568_v1, %v1220_v34  ;;  %v1343_v1 = vand.u32 4294901760, %v1342_v18  ;;  %v1350_v34 = vand.u32 4294901760, %v1349_v42  ;;  %v4097_v18 = vand.u32 4294901760, %v3636_v33 }
 0x114   :  { %1285 = vmatprep.mubr.f32.mxu1 %v1284_v39  ;;  %2395 = vmatpush1.bf16.msra.mxu1 %v2394_v9  ;;  %v2400_v9 = vpack.c.bf16 %v1336_v29, %v1329_v57  ;;  %v2475_v39 = vpack.c.bf16 %v1306_v26, %v1299_v49  ;;  %v3799_v49 = vsub.f32 %v3600_v52, %v1226_v36  ;;  %v1357_v57 = vand.u32 4294901760, %v1356_v14 }
 0x115   :  { %2396 = vmatprep.subr.bf16.mxu1 %v2591_v54  ;;  %2471 = vmatprep.subr.bf16.mxu0 %v2591_v54  ;;  %v2478_v26 = vpack.c.bf16 %v1320_v28, %v1313_v27  ;;  %v1377_v52 = vsub.f32 %v3757_v16, %v1376_v7  ;;  %v1383_v36 = vand.u32 4294901760, %v3773_v25  ;;  %v3820_v27 = vsub.f32 %v3605_v0, %v4096_v53 }
 0x116   :  { %v2403_v28 = vpack.c.bf16 %v1350_v34, %v1343_v1  ;;  %v1364_v29 = vand.u32 4294901760, %v1363_v43  ;;  %v4098_v42 = vand.u32 4294901760, %v3654_v19  ;;  %v4099_v0 = vand.u32 4294901760, %v3662_v60 }
 0x117   :  { %1291 = vmatmul.mubr.f32.gmra.mrb[14].mxu1 %v1290_v5  ;;  %2473 = vmatpush1.bf16.msra.mxu0 %v3704_v62  ;;  %v1384_v1 = vsub.f32 %v3773_v25, %v1383_v36  ;;  %v1397_v43 = vand.u32 4294901760, %v3799_v49 }
 0x118   :  { %2398 = vmatpush1.bf16.msra.mxu1 %v2397_v4  ;;  %1451 = vmatprep.mubr.f32.mxu1 %v3406_v47  ;;  %v3827_v4 = vsub.f32 %v3636_v33, %v4097_v18  ;;  %v2481_v5 = vpack.c.bf16 %v4099_v0, %v4098_v42  ;;  %v4100_v33 = vand.u32 4294901760, %v3641_v46 }
 0x119   :  { %2399 = vmatprep.subr.bf16.mxu1 %v2591_v54  ;;  %2474 = vmatprep.subr.bf16.mxu0 %v2591_v54  ;;  %v1398_v53 = vsub.f32 %v3799_v49, %v1397_v43 }
 0x11a   :  { %1673 = vmatmul.mubr.f32.vlgmr.msra.gmra.mrb[12].mxu0 %v1273_v30  ;;  %v1390_v30 = vand.u32 4294901760, %v3778_v20  ;;  %v3841_v14 = vsub.f32 %v3641_v46, %v4100_v33 }
 0x11b   :  { %1680 = vmatprep.mubr.f32.mxu0 %v4095_v45  ;;  %2476 = vmatpush1.bf16.msra.mxu0 %v2475_v39  ;;  %v1378_v39 = vand.u32 4294901760, %v1377_v52  ;;  %v1385_v52 = vand.u32 4294901760, %v1384_v1 }
 0x11c   :  { %2401 = vmatpush1.bf16.msra.mxu1 %v2400_v9  ;;  %2477 = vmatprep.subr.bf16.mxu0 %v2591_v54  ;;  %v1371_v9 = vand.u32 4294901760, %v1370_v2  ;;  %v1391_v34 = vsub.f32 %v3778_v20, %v1390_v30  ;;  %v2484_v2 = vpack.c.bf16 %v1348_v3, %v1341_v12  ;;  %v2487_v12 = vpack.c.bf16 %v1362_v59, %v1355_v55 }
 0x11d   :  { %2402 = vmatprep.subr.bf16.mxu1 %v2591_v54  ;;  %v1399_v3 = vand.u32 4294901760, %v1398_v53  ;;  %v2493_v1 = vpack.c.bf16 %v1390_v30, %v1383_v36  ;;  %v2424_v36 = vpack.c.bf16 %v3623_v8, %v3615_v61 }
 0x11e   :  { %1684 = vmatmul.mubr.f32.gmra.mrb[14].mxu0 %v1288_v40  ;;  %v2406_v40 = vpack.c.bf16 %v1364_v29, %v1357_v57  ;;  %v2409_v45 = vpack.c.bf16 %v1378_v39, %v1371_v9  ;;  %v1392_v46 = vand.u32 4294901760, %v1391_v34  ;;  %v1411_v57 = vand.u32 4294901760, %v3827_v4 }
 0x11f   :  { %2479 = vmatpush1.bf16.msra.mxu0 %v2478_v26  ;;  %1808 = vmatprep.mubr.f32.mxu0 %v3406_v47  ;;  %v1404_v26 = vand.u32 4294901760, %v3820_v27  ;;  %v1418_v29 = vand.u32 4294901760, %v3841_v14  ;;  %v2490_v9 = vpack.c.bf16 %v1376_v7, %v1369_v41  ;;  %v2421_v41 = vpack.c.bf16 %v3585_v48, %v3578_v22 }
 0x120   :  { %2404 = vmatpush1.bf16.msra.mxu1 %v2403_v28  ;;  %2480 = vmatprep.subr.bf16.mxu0 %v2591_v54  ;;  %v2412_v18 = vpack.c.bf16 %v1392_v46, %v1385_v52  ;;  %v1412_v0 = vsub.f32 %v3827_v4, %v1411_v57  ;;  %v2427_v22 = vpack.c.bf16 %v3662_v60, %v3654_v19 }
 0x121   :  { %2405 = vmatprep.subr.bf16.mxu1 %v2591_v54  ;;  %v1405_v28 = vsub.f32 %v3820_v27, %v1404_v26  ;;  %v2496_v33 = vpack.c.bf16 %v1404_v26, %v1397_v43  ;;  %v2499_v7 = vpack.c.bf16 %v1418_v29, %v1411_v57  ;;  %v2430_v48 = vpack.c.bf16 %v3697_v44, %v3691_v6 }
 0x122   :  { %v1413_v59 = vand.u32 4294901760, %v1412_v0 }
 0x123   :  { %2482 = vmatpush1.bf16.msra.mxu0 %v2481_v5  ;;  %v1406_v42 = vand.u32 4294901760, %v1405_v28  ;;  %v1419_v5 = vsub.f32 %v3841_v14, %v1418_v29 }
 0x124   :  { %2407 = vmatpush1.bf16.msra.mxu1 %v2406_v40  ;;  %2483 = vmatprep.subr.bf16.mxu0 %v2591_v54 }
 0x125   :  { %2408 = vmatprep.subr.bf16.mxu1 %v2591_v54  ;;  %v2415_v55 = vpack.c.bf16 %v1406_v42, %v1399_v3  ;;  %v1420_v39 = vand.u32 4294901760, %v1419_v5 }
 0x127   :  { %2485 = vmatpush1.bf16.msra.mxu0 %v2484_v2  ;;  %v2418_v34 = vpack.c.bf16 %v1420_v39, %v1413_v59 }
 0x128   :  { %2410 = vmatpush1.bf16.msra.mxu1 %v2409_v45  ;;  %2486 = vmatprep.subr.bf16.mxu0 %v2591_v54 }
 0x129   :  { %2411 = vmatprep.subr.bf16.mxu1 %v2591_v54 }
 0x12b   :  { %2488 = vmatpush1.bf16.msra.mxu0 %v2487_v12 }
 0x12c   :  { %2413 = vmatpush1.bf16.msra.mxu1 %v2412_v18  ;;  %2489 = vmatprep.subr.bf16.mxu0 %v2591_v54 }
 0x12d   :  { %2414 = vmatprep.subr.bf16.mxu1 %v2591_v54 }
 0x12f   :  { %2491 = vmatpush1.bf16.msra.mxu0 %v2490_v9 }
 0x130   :  { %2416 = vmatpush1.bf16.msra.mxu1 %v2415_v55  ;;  %2492 = vmatprep.subr.bf16.mxu0 %v2591_v54 }
 0x131   :  { %2417 = vmatprep.subr.bf16.mxu1 %v2591_v54 }
 0x133   :  { %2494 = vmatpush1.bf16.msra.mxu0 %v2493_v1 }
 0x134   :  { %2419 = vmatpush1.bf16.msra.mxu1 %v2418_v34  ;;  %2495 = vmatprep.subr.bf16.mxu0 %v2591_v54 }
 0x135   :  { %2420 = vmatprep.subr.bf16.mxu1 %v2591_v54 }
 0x137   :  { %1453 = vmatmul.mubr.f32.vlgmr.msra.gmra.mrb[12].mxu1 %v3608_v23  ;;  %2497 = vmatpush1.bf16.msra.mxu0 %v2496_v33 }
 0x138   :  { %1458 = vmatprep.mubr.f32.mxu1 %v3610_v11  ;;  %2422 = vmatpush1.bf16.msra.mxu1 %v2421_v41 }
 0x139   :  { %2423 = vmatprep.subr.bf16.mxu1 %v2591_v54  ;;  %2498 = vmatprep.subr.bf16.mxu0 %v2591_v54 }
 0x13b   :  { %1460 = vmatmul.mubr.f32.gmra.mrb[14].mxu1 %v3649_v58  ;;  %2500 = vmatpush1.bf16.msra.mxu0 %v2499_v7 }
 0x13c   :  { %2425 = vmatpush1.bf16.msra.mxu1 %v2424_v36  ;;  %1567 = vmatprep.mubr.f32.mxu1 %v3435_v21  ;;  %v2433_v21 = vpack.c.bf16 %v3732_v24, %v3724_v31 }
 0x13d   :  { %2426 = vmatprep.subr.bf16.mxu1 %v2591_v54  ;;  %2501 = vmatprep.subr.bf16.mxu0 %v2591_v54 }
 0x13e   :  { %1810 = vmatmul.mubr.f32.vlgmr.msra.gmra.mrb[12].mxu0 %v3608_v23 }
 0x13f   :  { %1815 = vmatprep.mubr.f32.mxu0 %v3610_v11  ;;  %2503 = vmatpush1.bf16.msra.mxu0 %v3465_v63  ;;  %v2436_v63 = vpack.c.bf16 %v3757_v16, %v3752_v13 }
 0x140   :  { %2428 = vmatpush1.bf16.msra.mxu1 %v2427_v22  ;;  %2504 = vmatprep.subr.bf16.mxu0 %v2591_v54 }
 0x141   :  { %2429 = vmatprep.subr.bf16.mxu1 %v2591_v54 }
 0x142   :  { %1817 = vmatmul.mubr.f32.gmra.mrb[14].mxu0 %v3649_v58 }
 0x143   :  { %2506 = vmatpush1.bf16.msra.mxu0 %v3491_v38  ;;  %1905 = vmatprep.mubr.f32.mxu0 %v3406_v47  ;;  %v2439_v47 = vpack.c.bf16 %v3778_v20, %v3773_v25  ;;  %v2442_v38 = vpack.c.bf16 %v3820_v27, %v3799_v49 }
 0x144   :  { %2431 = vmatpush1.bf16.msra.mxu1 %v2430_v48  ;;  %2507 = vmatprep.subr.bf16.mxu0 %v2591_v54 }
 0x145   :  { %2432 = vmatprep.subr.bf16.mxu1 %v2591_v54 }
 0x147   :  { %2509 = vmatpush1.bf16.msra.mxu0 %v3511_v35  ;;  %v2445_v35 = vpack.c.bf16 %v3841_v14, %v3827_v4 }
 0x148   :  { %2434 = vmatpush1.bf16.msra.mxu1 %v2433_v21  ;;  %2510 = vmatprep.subr.bf16.mxu0 %v2591_v54 }
 0x149   :  { %2435 = vmatprep.subr.bf16.mxu1 %v2591_v54 }
 0x14b   :  { %2512 = vmatpush1.bf16.msra.mxu0 %v3537_v15 }
 0x14c   :  { %2437 = vmatpush1.bf16.msra.mxu1 %v2436_v63  ;;  %2513 = vmatprep.subr.bf16.mxu0 %v2591_v54 }
 0x14d   :  { %2438 = vmatprep.subr.bf16.mxu1 %v2591_v54 }
 0x14f   :  { %2515 = vmatpush1.bf16.msra.mxu0 %v3560_v32 }
 0x150   :  { %2440 = vmatpush1.bf16.msra.mxu1 %v2439_v47  ;;  %2516 = vmatprep.subr.bf16.mxu0 %v2591_v54 }
 0x151   :  { %2441 = vmatprep.subr.bf16.mxu1 %v2591_v54 }
 0x153   :  { %2518 = vmatpush1.bf16.msra.mxu0 %v3593_v10 }
 0x154   :  { %2443 = vmatpush1.bf16.msra.mxu1 %v2442_v38  ;;  %2519 = vmatprep.subr.bf16.mxu0 %v2591_v54 }
 0x155   :  { %2444 = vmatprep.subr.bf16.mxu1 %v2591_v54 }
 0x157   :  { %2521 = vmatpush1.bf16.msra.mxu0 %v3631_v56 }
 0x158   :  { %2446 = vmatpush1.bf16.msra.mxu1 %v2445_v35  ;;  %2522 = vmatprep.subr.bf16.mxu0 %v2591_v54 }
 0x15b   :  { %1570 = vmatmul.mubr.f32.vlgmr.msra.gmra.mrb[12].mxu1 %v3647_v17  ;;  %2524 = vmatpush1.bf16.msra.mxu0 %v3669_v51 }
 0x15c   :  { %1576 = vmatprep.mubr.f32.mxu1 %v3657_v50  ;;  %2525 = vmatprep.subr.bf16.mxu0 %v2591_v54 }
 0x15f   :  { %1579 = vmatmul.mubr.f32.gmra.mrb[14].mxu1 %v3686_v37  ;;  %2527 = vmatpush1.bf16.msra.mxu0 %v3704_v62 }
 0x162   :  { %1907 = vmatmul.mubr.f32.vlgmr.msra.gmra.mrb[12].mxu0 %v3608_v23 }
 0x163   :  { %1912 = vmatprep.mubr.f32.mxu0 %v3610_v11 }
 0x166   :  { %1914 = vmatmul.mubr.f32.gmra.mrb[14].mxu0 %v3649_v58 }
 0x181   :  { %v2016_v15 = vpop.f32.mrb[0].mxu1 }
 0x182   :  { %v2017_v32 = vpop.f32.mrb[1].mxu1 }
 0x183   :  { %v2018_v10 = vadd.f32 %v2017_v32, %v2016_v15 }
 0x185   :  { %v2019_v61 = vpop.f32.mrb[2].mxu1 }
 0x186   :  { %v2020_v8 = vpop.f32.mrb[3].mxu1 }
 0x187   :  { %v2021_v56 = vadd.f32 %v2020_v8, %v2019_v61 }
 0x189   :  { %v1978_v17 = vpop.f32.mrb[0].mxu0 }
 0x18a   :  { %v1979_v19 = vpop.f32.mrb[1].mxu0 }
 0x18b   :  { %v1980_v50 = vadd.f32 %v1979_v19, %v1978_v17 }
 0x18d   :  { %v621_v54 = vadd.f32 %v2018_v10, %v1980_v50  ;;  %v1981_v60 = vpop.f32.mrb[2].mxu0 }
 0x18e   :  { %v1982_v51 = vpop.f32.mrb[3].mxu0 }
 0x18f   :  { %v1983_v37 = vadd.f32 %v1982_v51, %v1981_v60 }
 0x191   :  { %v628_v6 = vadd.f32 %v2021_v56, %v1983_v37 }
 0x1a1   :  { %v2092_v44 = vpop.f32.mrb[4].mxu1 }
 0x1a2   :  { %v2093_v23 = vpop.f32.mrb[5].mxu1 }
 0x1a3   :  { %v2094_v62 = vadd.f32 %v2093_v23, %v2092_v44 }
 0x1a5   :  { %v2095_v11 = vpop.f32.mrb[6].mxu1 }
 0x1a6   :  { %v2096_v13 = vpop.f32.mrb[7].mxu1 }
 0x1a7   :  { %v2097_v58 = vadd.f32 %v2096_v13, %v2095_v11 }
 0x1a9   :  { %v2054_v31 = vpop.f32.mrb[4].mxu0 }
 0x1aa   :  { %v2055_v24 = vpop.f32.mrb[5].mxu0 }
 0x1ab   :  { %v2056_v16 = vadd.f32 %v2055_v24, %v2054_v31 }
 0x1ad   :  { %v766_v25 = vadd.f32 %v2056_v16, %v621_v54  ;;  %v2057_v20 = vpop.f32.mrb[6].mxu0 }
 0x1ae   :  { %v2058_v49 = vpop.f32.mrb[7].mxu0 }
 0x1af   :  { %v2059_v30 = vadd.f32 %v2058_v49, %v2057_v20  ;;  %v883_v27 = vadd.f32 %v2094_v62, %v766_v25 }
 0x1b1   :  { %v775_v4 = vadd.f32 %v2059_v30, %v628_v6 }
 0x1b3   :  { %v894_v14 = vadd.f32 %v2097_v58, %v775_v4 }
 0x1c2   :  { %v2168_v40 = vpop.f32.mrb[8].mxu1 }
 0x1c3   :  { %v2169_v43 = vpop.f32.mrb[9].mxu1 }
 0x1c4   :  { %v2170_v26 = vadd.f32 %v2169_v43, %v2168_v40 }
 0x1c6   :  { %v2171_v45 = vpop.f32.mrb[10].mxu1 }
 0x1c7   :  { %v2172_v2 = vpop.f32.mrb[11].mxu1 }
 0x1c8   :  { %v2173_v52 = vadd.f32 %v2172_v2, %v2171_v45 }
 0x1c9   :  { %v2130_v46 = vpop.f32.mrb[8].mxu0 }
 0x1ca   :  { %v2131_v53 = vpop.f32.mrb[9].mxu0 }
 0x1cb   :  { %v2132_v28 = vadd.f32 %v2131_v53, %v2130_v46 }
 0x1cd   :  { %v1062_v57 = vadd.f32 %v2132_v28, %v883_v27  ;;  %v2133_v29 = vpop.f32.mrb[10].mxu0 }
 0x1ce   :  { %v2134_v18 = vpop.f32.mrb[11].mxu0 }
 0x1cf   :  { %v2135_v12 = vadd.f32 %v2134_v18, %v2133_v29  ;;  %v1173_v3 = vadd.f32 %v2170_v26, %v1062_v57 }
 0x1d1   :  { %v1069_v42 = vadd.f32 %v2135_v12, %v894_v14 }
 0x1d3   :  { %v1180_v0 = vadd.f32 %v2173_v52, %v1069_v42 }
 0x22e   :  { %v1571_v5 = vpop.f32.mrb[12].mxu1 }
 0x22f   :  { %v2528_v9 = vadd.f32 %v1571_v5, %v1173_v3  ;;  %v1573_v55 = vpop.f32.mrb[13].mxu1 }
 0x232   :  { %v1580_v59 = vpop.f32.mrb[14].mxu1 }
 0x233   :  { %v2530_v39 = vadd.f32 %v1580_v59, %v1180_v0  ;;  %v1582_v1 = vpop.f32.mrb[15].mxu1 }
 0x235   :  { %v1908_v34 = vpop.f32.mrb[12].mxu0 }
 0x236   :  { %v2529_v33 = vadd.f32 %v2528_v9, %v1908_v34  ;;  %v1910_v41 = vpop.f32.mrb[13].mxu0 }
 0x238   :  { %1921 = vrot.lane.b32.xlu0 %v2529_v33, %s2592_s4 }
 0x239   :  { %v1915_v7 = vpop.f32.mrb[14].mxu0 }
 0x23a   :  { %v2531_v36 = vadd.f32 %v2530_v39, %v1915_v7  ;;  %v1917_v22 = vpop.f32.mrb[15].mxu0 }
 0x23c   :  { %1923 = vrot.lane.b32.xlu1 %v2531_v36, %s2592_s4 }
 0x2aa   :  { %v1922_v48 = vpop.permute.xlu0 %1921 }
 0x2ab   :  { %2586 = vrcp.f32 %v1922_v48 }
 0x2ae   :  { %v1924_v21 = vpop.permute.xlu1 %1923 }
 0x2af   :  { %2588 = vrcp.f32 %v1924_v21 }
 0x2b5   :  { %v2587_v63 = vpop.eup %2586 }
 0x2b6   :  { %v1928_v47 = vmul.f32 %v2587_v63, %v2529_v33 }
 0x2b8   :  { %1933 = vrot.lane.b32.xlu0 %v1928_v47, %s2593_s14 }
 0x2b9   :  { %v2589_v38 = vpop.eup %2588 }
 0x2ba   :  { %v1930_v35 = vmul.f32 %v2589_v38, %v2531_v36 }
 0x2bc   :  { %1935 = vrot.lane.b32.xlu1 %v1930_v35, %s2593_s14 }
 0x32a   :  { %v1934_v15 = vpop.permute.xlu0 %1933 }
 0x32b   :  { %1940 = vst.msk [vmem:[%s3945_s5] sm:$0xff] %vm1939_vm1, %v1934_v15 }
 0x32e   :  { %v1936_v32 = vpop.permute.xlu1 %1935 }
 0x32f   :  { %1941 = vst.msk [vmem:[%s3945_s5 + $0x8] sm:$0xff] %vm1939_vm1, %v1936_v32 }

</bundles_post_ra>
